<compile_context>
chip_gen: v6e
topology: v6e:2x2x1
jax: 0.10.0
libtpu: 0.0.40
codegen_flags: <defaults>
</compile_context>

<pallas_src>
import functools

import jax
import jax.numpy as jnp
from jax.experimental import pallas as pl
from jax.experimental.pallas import tpu as pltpu

# Module hyper-parameters (defaults of TemporalSMPLShapeRegressor).
S = 8          # seq_len / token-mixing "channels"
IN_DIM = 128   # input feature dim
DIM = 256      # mixer hidden dim
OUT_DIM = 21   # output dim
EXPANSION = 4  # FeedForward expansion factor
LN_EPS = 1e-5  # torch.nn.LayerNorm default eps

OUT_PAD = 128  # lane-dense padded output width (sliced to 21 in wrapper)

PARAM_ORDER = (
    "w_in", "b_in",
    "g1", "be1", "wt1", "bt1", "wt2", "bt2",
    "g2", "be2", "w1", "b1", "w2", "b2",
    "g3", "be3", "w_out", "b_out",
)


def _layernorm(x, gamma, beta, eps=LN_EPS):
    mu = jnp.mean(x, axis=-1, keepdims=True)
    var = jnp.mean((x - mu) ** 2, axis=-1, keepdims=True)  # biased var (torch)
    return (x - mu) * jax.lax.rsqrt(var + eps) * gamma + beta


def _layernorm_noaffine(x, eps=LN_EPS):
    mu = jnp.mean(x, axis=-1, keepdims=True)
    var = jnp.mean((x - mu) ** 2, axis=-1, keepdims=True)
    return (x - mu) * jax.lax.rsqrt(var + eps)


def _gelu_tanh(x):
    # tanh-approximate GELU: single EUP tanh instead of a long erf VALU polynomial.
    return jax.nn.gelu(x, approximate=True)


def _gelu_exact(x):
    # Exact erf GELU (torch.nn.GELU() default) -- used by the pure-JAX reference.
    return 0.5 * x * (1.0 + jax.lax.erf(x * 0.7071067811865476))


def mixer_kernel(x_ref,
                 w_in_ref, vec_ref,
                 wt1_ref, bt1_ref, wt2_ref, bt2_ref,
                 w1_ref, b1_ref, w2_ref,
                 w_out_ref, b_out_ref,
                 o_ref):
    # bf16 MXU operands, f32 accumulation; all elementwise math in f32.
    dot = functools.partial(jnp.dot, preferred_element_type=jnp.float32)
    bf16 = jnp.bfloat16

    b_in = vec_ref[0]
    g1, be1 = vec_ref[1], vec_ref[2]
    g2, be2 = vec_ref[3], vec_ref[4]
    b2 = vec_ref[5]

    x = x_ref[...].astype(bf16)                      # (M, IN_DIM), M = B_TILE*S

    # ---- input projection: Linear(in_dim -> dim) ----
    h = dot(x, w_in_ref[...]) + b_in                 # (M, DIM) f32

    # ---- token-mixing block (block-diagonal Conv1d-k1 MLP across S per item) ----
    xn = _layernorm(h, g1, be1).astype(bf16)         # (M, DIM)
    t = dot(wt1_ref[...], xn) + bt1_ref[...]         # (M*EXP, DIM) f32
    t = _gelu_tanh(t).astype(bf16)
    t = dot(wt2_ref[...], t) + bt2_ref[...]          # (M, DIM) f32
    h = h + t

    # ---- channel-mixing block: PreNormResidual(LN, Linear MLP over DIM) ----
    xn = _layernorm(h, g2, be2).astype(bf16)
    c = dot(xn, w1_ref[...]) + b1_ref[0]             # (M, DIM*EXP) f32
    c = _gelu_tanh(c).astype(bf16)
    c = dot(c, w2_ref[...]) + b2                     # (M, DIM) f32
    h = h + c

    # ---- final LayerNorm (affine folded into w_out/b_out) + lane-dense output ----
    xn = _layernorm_noaffine(h).astype(bf16)
    y = dot(xn, w_out_ref[...]) + b_out_ref[0]       # (M, OUT_PAD) f32
    o_ref[...] = y.astype(o_ref.dtype)


def _select_b_tile(batch):
    """Per-TPU-generation batch tile (rows/step = b_tile * S)."""
    try:
        kind = jax.devices()[0].device_kind.lower()
    except Exception:  # pragma: no cover - defensive
        kind = ""
    # v5e: 128x128 MXU -> m_tile=128 is one K-tile, halving kron zero-waste.
    bt = 16 if "v5" in kind else 32
    # v7x: 2 TensorCores share the "parallel" grid axis -> force >= 2 steps.
    if ("v7" in kind or "7x" in kind) and batch >= 2:
        bt = min(bt, pl.cdiv(batch, 2))
    return max(1, min(bt, batch))


def _prepare_params(params, b_tile):
    """Host-side parameter prep (kron block-diag, LN-affine fold, bf16 casts)."""
    f32, bf16 = jnp.float32, jnp.bfloat16
    p = {k: params[k].astype(f32) for k in PARAM_ORDER}
    eye = jnp.eye(b_tile, dtype=f32)

    # Block-diagonal token-mixing weights: kron(I, W) == blockdiag(W, ..., W).
    wt1_bd = jnp.kron(eye, p["wt1"]).astype(bf16)    # (m_tile*EXP, m_tile)
    wt2_bd = jnp.kron(eye, p["wt2"]).astype(bf16)    # (m_tile, m_tile*EXP)
    bt1_bd = jnp.tile(p["bt1"], (b_tile, 1))         # (m_tile*EXP, 1) f32
    bt2_bd = jnp.tile(p["bt2"], (b_tile, 1))         # (m_tile, 1) f32

    # Fold final LayerNorm affine into the output projection.
    w_out_f = p["g3"][0][:, None] * p["w_out"]                   # (DIM, OUT_DIM)
    b_out_f = p["be3"] @ p["w_out"] + p["b_out"]                 # (1, OUT_DIM)
    w_out_p = jnp.pad(w_out_f, ((0, 0), (0, OUT_PAD - OUT_DIM))).astype(bf16)
    b_out_p = jnp.pad(b_out_f, ((0, 0), (0, OUT_PAD - OUT_DIM)))  # f32

    # Pack the DIM-wide per-feature vectors into one (6, DIM) array.
    vecs = jnp.concatenate(
        [p["b_in"], p["g1"], p["be1"], p["g2"], p["be2"], p["b2"]], axis=0)

    return (p["w_in"].astype(bf16), vecs,
            wt1_bd, bt1_bd, wt2_bd, bt2_bd,
            p["w1"].astype(bf16), p["b1"], p["w2"].astype(bf16),
            w_out_p, b_out_p)


@functools.partial(jax.jit, static_argnames=("b_tile",))
def temporal_smpl_shape_regressor(x, params, b_tile=None):
    """x: [B, S, IN_DIM] float32  ->  y: [B, S, OUT_DIM] float32."""
    B, s, in_dim = x.shape
    assert s == S and in_dim == IN_DIM

    if b_tile is None:
        b_tile = _select_b_tile(B)
    b_tile = max(1, min(int(b_tile), B))
    n_tiles = pl.cdiv(B, b_tile)
    padded_b = n_tiles * b_tile
    if padded_b != B:
        x = jnp.pad(x, ((0, padded_b - B), (0, 0), (0, 0)))

    m_tile = b_tile * S
    x_flat = x.reshape(padded_b * S, IN_DIM)         # contiguous, free reshape

    plist = _prepare_params(params, b_tile)          # cached via jit per (shape, b_tile)

    in_specs = [pl.BlockSpec((m_tile, IN_DIM), lambda i: (i, 0))]
    # All parameters are 2-D, fully resident (same block every step -> one fetch).
    in_specs += [pl.BlockSpec(w.shape, lambda i: (0, 0)) for w in plist]

    rows = padded_b * S
    cost = pl.CostEstimate(
        flops=int(2 * rows * (IN_DIM * DIM
                              + 2 * EXPANSION * m_tile * DIM
                              + 2 * EXPANSION * DIM * DIM
                              + DIM * OUT_PAD)),
        transcendentals=int(2 * rows * EXPANSION * DIM),
        bytes_accessed=int(x_flat.size * 4
                           + sum(int(w.size) * w.dtype.itemsize for w in plist)
                           + rows * OUT_PAD * 4),
    )

    y_flat = pl.pallas_call(
        mixer_kernel,
        out_shape=jax.ShapeDtypeStruct((rows, OUT_PAD), jnp.float32),
        grid=(n_tiles,),
        in_specs=in_specs,
        out_specs=pl.BlockSpec((m_tile, OUT_PAD), lambda i: (i, 0)),
        compiler_params=pltpu.CompilerParams(
            dimension_semantics=("parallel",),
            vmem_limit_bytes=32 * 1024 * 1024,
        ),
        cost_estimate=cost,
    )(x_flat, *plist)

    y = y_flat.reshape(padded_b, S, OUT_PAD)
    return y[:B, :, :OUT_DIM]


def init_params(key):
    """Deterministic synthetic parameters (torch-style uniform init shapes)."""
    ks = jax.random.split(key, 12)

    def lin(k, fan_in, shape):
        bound = 1.0 / float(fan_in) ** 0.5
        return jax.random.uniform(k, shape, jnp.float32, -bound, bound)

    return {
        # Linear(in_dim, dim)
        "w_in": lin(ks[0], IN_DIM, (IN_DIM, DIM)),
        "b_in": lin(ks[1], IN_DIM, (1, DIM)),
        # token-mixing PreNormResidual
        "g1": jnp.ones((1, DIM), jnp.float32),
        "be1": jnp.zeros((1, DIM), jnp.float32),
        "wt1": lin(ks[2], S, (S * EXPANSION, S)),          # Conv1d(S, 4S, 1) weight
        "bt1": lin(ks[3], S, (S * EXPANSION, 1)),          # Conv1d(S, 4S, 1) bias
        "wt2": lin(ks[4], S * EXPANSION, (S, S * EXPANSION)),
        "bt2": lin(ks[5], S * EXPANSION, (S, 1)),
        # channel-mixing PreNormResidual
        "g2": jnp.ones((1, DIM), jnp.float32),
        "be2": jnp.zeros((1, DIM), jnp.float32),
        "w1": lin(ks[6], DIM, (DIM, DIM * EXPANSION)),
        "b1": lin(ks[7], DIM, (1, DIM * EXPANSION)),
        "w2": lin(ks[8], DIM * EXPANSION, (DIM * EXPANSION, DIM)),
        "b2": lin(ks[9], DIM * EXPANSION, (1, DIM)),
        # final LayerNorm + Linear(dim, out_dim)
        "g3": jnp.ones((1, DIM), jnp.float32),
        "be3": jnp.zeros((1, DIM), jnp.float32),
        "w_out": lin(ks[10], DIM, (DIM, OUT_DIM)),
        "b_out": lin(ks[11], DIM, (1, OUT_DIM)),
    }


def reference(x, p):
    """Pure-JAX reference mirroring the PyTorch forward pass (f32, exact GELU)."""
    def ln(v, g, b):
        mu = jnp.mean(v, axis=-1, keepdims=True)
        var = jnp.mean((v - mu) ** 2, axis=-1, keepdims=True)
        return (v - mu) * jax.lax.rsqrt(var + LN_EPS) * g + b

    hi = jax.lax.Precision.HIGHEST
    h = jnp.einsum("bsi,io->bso", x, p["w_in"], precision=hi) + p["b_in"][0]
    # token mixing (Conv1d k=1 over channels=S)
    xn = ln(h, p["g1"][0], p["be1"][0])
    t = jnp.einsum("os,bsd->bod", p["wt1"], xn, precision=hi) + p["bt1"][None, :, :]
    t = _gelu_exact(t)
    t = jnp.einsum("os,bsd->bod", p["wt2"], t, precision=hi) + p["bt2"][None, :, :]
    h = h + t
    # channel mixing
    xn = ln(h, p["g2"][0], p["be2"][0])
    c = jnp.einsum("bsd,de->bse", xn, p["w1"], precision=hi) + p["b1"][0]
    c = _gelu_exact(c)
    c = jnp.einsum("bse,ed->bsd", c, p["w2"], precision=hi) + p["b2"][0]
    h = h + c
    # final LN + output projection
    xn = ln(h, p["g3"][0], p["be3"][0])
    return jnp.einsum("bsd,do->bso", xn, p["w_out"], precision=hi) + p["b_out"][0]


if __name__ == "__main__":
    key = jax.random.PRNGKey(0)
    kx, kx2, kp = jax.random.split(key, 3)

    params = init_params(kp)

    # Tiny-batch harness case (single or two grid steps depending on chip gen).
    B = 2
    x = jax.random.normal(kx, (B, S, IN_DIM), jnp.float32)   # [batch, seq, 128]
    y = jax.block_until_ready(temporal_smpl_shape_regressor(x, params))
    assert y.shape == (B, S, OUT_DIM), y.shape
    assert bool(jnp.all(jnp.isfinite(y)))

    y_ref = reference(x, params)
    max_err = float(jnp.max(jnp.abs(y - y_ref)))
    scale = max(1.0, float(jnp.max(jnp.abs(y_ref))))
    # Kernel runs bf16 MXU passes (f32 accumulation) and tanh-approximate GELU
    # against an f32 / exact-erf reference; tolerance is set accordingly.
    assert max_err < 4e-2 * scale, f"mismatch vs reference: {max_err}"

    # Exercise the multi-tile + batch-padding path as well (grid > 1).
    B2 = 13
    x2 = jax.random.normal(kx2, (B2, S, IN_DIM), jnp.float32)
    y2 = jax.block_until_ready(
        temporal_smpl_shape_regressor(x2, params, b_tile=4))
    y2_ref = reference(x2, params)
    assert y2.shape == (B2, S, OUT_DIM), y2.shape
    err2 = float(jnp.max(jnp.abs(y2 - y2_ref)))
    scale2 = max(1.0, float(jnp.max(jnp.abs(y2_ref))))
    assert err2 < 4e-2 * scale2, f"mismatch vs reference (tiled): {err2}"

    print("KERNEL_OK")
</pallas_src>

<mosaic_0001>
module attributes {stable_mosaic.version = 11 : i64} {
  func.func @mixer_kernel(%arg0: i32, %arg1: memref<16x128xf32, #tpu.memory_space<vmem>>, %arg2: memref<128x256xbf16, #tpu.memory_space<vmem>>, %arg3: memref<6x256xf32, #tpu.memory_space<vmem>>, %arg4: memref<64x16xbf16, #tpu.memory_space<vmem>>, %arg5: memref<64x1xf32, #tpu.memory_space<vmem>>, %arg6: memref<16x64xbf16, #tpu.memory_space<vmem>>, %arg7: memref<16x1xf32, #tpu.memory_space<vmem>>, %arg8: memref<256x1024xbf16, #tpu.memory_space<vmem>>, %arg9: memref<1x1024xf32, #tpu.memory_space<vmem>>, %arg10: memref<1024x256xbf16, #tpu.memory_space<vmem>>, %arg11: memref<256x128xbf16, #tpu.memory_space<vmem>>, %arg12: memref<1x128xf32, #tpu.memory_space<vmem>>, %arg13: memref<16x128xf32, #tpu.memory_space<vmem>>) attributes {dimension_semantics = [#tpu.dimension_semantics<parallel>], iteration_bounds = array<i64: 1>, scalar_prefetch = 0 : i64, scratch_operands = 0 : i64, tpu.core_type = #tpu.core_type<tc>, window_params = [{transform_indices = @transform_0, window_bounds = array<i64: 16, 128>}, {pipeline_mode = #tpu.pipeline_mode<synchronous>, transform_indices = @transform_1, window_bounds = array<i64: 128, 256>}, {pipeline_mode = #tpu.pipeline_mode<synchronous>, transform_indices = @transform_2, window_bounds = array<i64: 6, 256>}, {pipeline_mode = #tpu.pipeline_mode<synchronous>, transform_indices = @transform_3, window_bounds = array<i64: 64, 16>}, {pipeline_mode = #tpu.pipeline_mode<synchronous>, transform_indices = @transform_4, window_bounds = array<i64: 64, 1>}, {pipeline_mode = #tpu.pipeline_mode<synchronous>, transform_indices = @transform_5, window_bounds = array<i64: 16, 64>}, {pipeline_mode = #tpu.pipeline_mode<synchronous>, transform_indices = @transform_6, window_bounds = array<i64: 16, 1>}, {pipeline_mode = #tpu.pipeline_mode<synchronous>, transform_indices = @transform_7, window_bounds = array<i64: 256, 1024>}, {pipeline_mode = #tpu.pipeline_mode<synchronous>, transform_indices = @transform_8, window_bounds = array<i64: 1, 1024>}, {pipeline_mode = #tpu.pipeline_mode<synchronous>, transform_indices = @transform_9, window_bounds = array<i64: 1024, 256>}, {pipeline_mode = #tpu.pipeline_mode<synchronous>, transform_indices = @transform_10, window_bounds = array<i64: 256, 128>}, {pipeline_mode = #tpu.pipeline_mode<synchronous>, transform_indices = @transform_11, window_bounds = array<i64: 1, 128>}, {transform_indices = @transform_12, window_bounds = array<i64: 16, 128>}]} {
    %c0 = arith.constant 0 : index
    %c0_0 = arith.constant 0 : index
    %0 = vector.load %arg3[%c0, %c0_0] : memref<6x256xf32, #tpu.memory_space<vmem>>, vector<1x256xf32>
    %1 = vector.shape_cast %0 : vector<1x256xf32> to vector<256xf32>
    %c1 = arith.constant 1 : index
    %c0_1 = arith.constant 0 : index
    %2 = vector.load %arg3[%c1, %c0_1] : memref<6x256xf32, #tpu.memory_space<vmem>>, vector<1x256xf32>
    %3 = vector.shape_cast %2 : vector<1x256xf32> to vector<256xf32>
    %c2 = arith.constant 2 : index
    %c0_2 = arith.constant 0 : index
    %4 = vector.load %arg3[%c2, %c0_2] : memref<6x256xf32, #tpu.memory_space<vmem>>, vector<1x256xf32>
    %5 = vector.shape_cast %4 : vector<1x256xf32> to vector<256xf32>
    %c3 = arith.constant 3 : index
    %c0_3 = arith.constant 0 : index
    %6 = vector.load %arg3[%c3, %c0_3] : memref<6x256xf32, #tpu.memory_space<vmem>>, vector<1x256xf32>
    %7 = vector.shape_cast %6 : vector<1x256xf32> to vector<256xf32>
    %c4 = arith.constant 4 : index
    %c0_4 = arith.constant 0 : index
    %8 = vector.load %arg3[%c4, %c0_4] : memref<6x256xf32, #tpu.memory_space<vmem>>, vector<1x256xf32>
    %9 = vector.shape_cast %8 : vector<1x256xf32> to vector<256xf32>
    %c5 = arith.constant 5 : index
    %c0_5 = arith.constant 0 : index
    %10 = vector.load %arg3[%c5, %c0_5] : memref<6x256xf32, #tpu.memory_space<vmem>>, vector<1x256xf32>
    %11 = vector.shape_cast %10 : vector<1x256xf32> to vector<256xf32>
    %c0_6 = arith.constant 0 : index
    %c0_7 = arith.constant 0 : index
    %12 = vector.load %arg1[%c0_6, %c0_7] : memref<16x128xf32, #tpu.memory_space<vmem>>, vector<16x128xf32>
    %13 = arith.truncf %12 : vector<16x128xf32> to vector<16x128xbf16>
    %c0_8 = arith.constant 0 : index
    %c0_9 = arith.constant 0 : index
    %14 = vector.load %arg2[%c0_8, %c0_9] : memref<128x256xbf16, #tpu.memory_space<vmem>>, vector<128x256xbf16>
    %cst = arith.constant dense<0.000000e+00> : vector<16x256xf32>
    %15 = tpu.matmul %13, %14, %cst {dimension_numbers = #tpu.dot_dimension_numbers<[1], [0], [0], [1], [0, 0, 1, 1], [], []>} : vector<16x128xbf16>, vector<128x256xbf16>, vector<16x256xf32> -> vector<16x256xf32>
    %16 = vector.shape_cast %1 : vector<256xf32> to vector<1x256xf32>
    %17 = vector.broadcast %16 : vector<1x256xf32> to vector<16x256xf32>
    %18 = arith.addf %15, %17 : vector<16x256xf32>
    %cst_10 = arith.constant dense<0.000000e+00> : vector<16xf32>
    %19 = vector.multi_reduction <add>, %18, %cst_10 [1] : vector<16x256xf32> to vector<16xf32>
    %20 = vector.shape_cast %19 : vector<16xf32> to vector<16x1xf32>
    %cst_11 = arith.constant 2.560000e+02 : f32
    %21 = vector.broadcast %cst_11 : f32 to vector<16x1xf32>
    %22 = arith.divf %20, %21 : vector<16x1xf32>
    %23 = vector.broadcast %22 : vector<16x1xf32> to vector<16x256xf32>
    %24 = arith.subf %18, %23 : vector<16x256xf32>
    %25 = arith.mulf %24, %24 : vector<16x256xf32>
    %cst_12 = arith.constant dense<0.000000e+00> : vector<16xf32>
    %26 = vector.multi_reduction <add>, %25, %cst_12 [1] : vector<16x256xf32> to vector<16xf32>
    %27 = vector.shape_cast %26 : vector<16xf32> to vector<16x1xf32>
    %cst_13 = arith.constant 2.560000e+02 : f32
    %28 = vector.broadcast %cst_13 : f32 to vector<16x1xf32>
    %29 = arith.divf %27, %28 : vector<16x1xf32>
    %30 = vector.broadcast %22 : vector<16x1xf32> to vector<16x256xf32>
    %31 = arith.subf %18, %30 : vector<16x256xf32>
    %cst_14 = arith.constant 9.99999974E-6 : f32
    %32 = vector.broadcast %cst_14 : f32 to vector<16x1xf32>
    %33 = arith.addf %29, %32 : vector<16x1xf32>
    %34 = math.rsqrt %33 : vector<16x1xf32>
    %35 = vector.broadcast %34 : vector<16x1xf32> to vector<16x256xf32>
    %36 = arith.mulf %31, %35 : vector<16x256xf32>
    %37 = vector.shape_cast %3 : vector<256xf32> to vector<1x256xf32>
    %38 = vector.broadcast %37 : vector<1x256xf32> to vector<16x256xf32>
    %39 = arith.mulf %36, %38 : vector<16x256xf32>
    %40 = vector.shape_cast %5 : vector<256xf32> to vector<1x256xf32>
    %41 = vector.broadcast %40 : vector<1x256xf32> to vector<16x256xf32>
    %42 = arith.addf %39, %41 : vector<16x256xf32>
    %43 = arith.truncf %42 : vector<16x256xf32> to vector<16x256xbf16>
    %c0_15 = arith.constant 0 : index
    %c0_16 = arith.constant 0 : index
    %44 = vector.load %arg4[%c0_15, %c0_16] : memref<64x16xbf16, #tpu.memory_space<vmem>>, vector<64x16xbf16>
    %cst_17 = arith.constant dense<0.000000e+00> : vector<64x256xf32>
    %45 = tpu.matmul %44, %43, %cst_17 {dimension_numbers = #tpu.dot_dimension_numbers<[1], [0], [0], [1], [0, 0, 1, 1], [], []>} : vector<64x16xbf16>, vector<16x256xbf16>, vector<64x256xf32> -> vector<64x256xf32>
    %c0_18 = arith.constant 0 : index
    %c0_19 = arith.constant 0 : index
    %46 = vector.load %arg5[%c0_18, %c0_19] : memref<64x1xf32, #tpu.memory_space<vmem>>, vector<64x1xf32>
    %47 = vector.broadcast %46 : vector<64x1xf32> to vector<64x256xf32>
    %48 = arith.addf %45, %47 : vector<64x256xf32>
    %49 = arith.mulf %48, %48 : vector<64x256xf32>
    %50 = arith.mulf %48, %49 : vector<64x256xf32>
    %cst_20 = arith.constant 4.471500e-02 : f32
    %51 = vector.broadcast %cst_20 : f32 to vector<64x256xf32>
    %52 = arith.mulf %51, %50 : vector<64x256xf32>
    %53 = arith.addf %48, %52 : vector<64x256xf32>
    %cst_21 = arith.constant 0.797884583 : f32
    %54 = vector.broadcast %cst_21 : f32 to vector<64x256xf32>
    %55 = arith.mulf %54, %53 : vector<64x256xf32>
    %56 = math.tanh %55 : vector<64x256xf32>
    %cst_22 = arith.constant 1.000000e+00 : f32
    %57 = vector.broadcast %cst_22 : f32 to vector<64x256xf32>
    %58 = arith.addf %57, %56 : vector<64x256xf32>
    %cst_23 = arith.constant 5.000000e-01 : f32
    %59 = vector.broadcast %cst_23 : f32 to vector<64x256xf32>
    %60 = arith.mulf %59, %58 : vector<64x256xf32>
    %61 = arith.mulf %48, %60 : vector<64x256xf32>
    %62 = arith.truncf %61 : vector<64x256xf32> to vector<64x256xbf16>
    %c0_24 = arith.constant 0 : index
    %c0_25 = arith.constant 0 : index
    %63 = vector.load %arg6[%c0_24, %c0_25] : memref<16x64xbf16, #tpu.memory_space<vmem>>, vector<16x64xbf16>
    %cst_26 = arith.constant dense<0.000000e+00> : vector<16x256xf32>
    %64 = tpu.matmul %63, %62, %cst_26 {dimension_numbers = #tpu.dot_dimension_numbers<[1], [0], [0], [1], [0, 0, 1, 1], [], []>} : vector<16x64xbf16>, vector<64x256xbf16>, vector<16x256xf32> -> vector<16x256xf32>
    %c0_27 = arith.constant 0 : index
    %c0_28 = arith.constant 0 : index
    %65 = vector.load %arg7[%c0_27, %c0_28] : memref<16x1xf32, #tpu.memory_space<vmem>>, vector<16x1xf32>
    %66 = vector.broadcast %65 : vector<16x1xf32> to vector<16x256xf32>
    %67 = arith.addf %64, %66 : vector<16x256xf32>
    %68 = arith.addf %18, %67 : vector<16x256xf32>
    %cst_29 = arith.constant dense<0.000000e+00> : vector<16xf32>
    %69 = vector.multi_reduction <add>, %68, %cst_29 [1] : vector<16x256xf32> to vector<16xf32>
    %70 = vector.shape_cast %69 : vector<16xf32> to vector<16x1xf32>
    %cst_30 = arith.constant 2.560000e+02 : f32
    %71 = vector.broadcast %cst_30 : f32 to vector<16x1xf32>
    %72 = arith.divf %70, %71 : vector<16x1xf32>
    %73 = vector.broadcast %72 : vector<16x1xf32> to vector<16x256xf32>
    %74 = arith.subf %68, %73 : vector<16x256xf32>
    %75 = arith.mulf %74, %74 : vector<16x256xf32>
    %cst_31 = arith.constant dense<0.000000e+00> : vector<16xf32>
    %76 = vector.multi_reduction <add>, %75, %cst_31 [1] : vector<16x256xf32> to vector<16xf32>
    %77 = vector.shape_cast %76 : vector<16xf32> to vector<16x1xf32>
    %cst_32 = arith.constant 2.560000e+02 : f32
    %78 = vector.broadcast %cst_32 : f32 to vector<16x1xf32>
    %79 = arith.divf %77, %78 : vector<16x1xf32>
    %80 = vector.broadcast %72 : vector<16x1xf32> to vector<16x256xf32>
    %81 = arith.subf %68, %80 : vector<16x256xf32>
    %cst_33 = arith.constant 9.99999974E-6 : f32
    %82 = vector.broadcast %cst_33 : f32 to vector<16x1xf32>
    %83 = arith.addf %79, %82 : vector<16x1xf32>
    %84 = math.rsqrt %83 : vector<16x1xf32>
    %85 = vector.broadcast %84 : vector<16x1xf32> to vector<16x256xf32>
    %86 = arith.mulf %81, %85 : vector<16x256xf32>
    %87 = vector.shape_cast %7 : vector<256xf32> to vector<1x256xf32>
    %88 = vector.broadcast %87 : vector<1x256xf32> to vector<16x256xf32>
    %89 = arith.mulf %86, %88 : vector<16x256xf32>
    %90 = vector.shape_cast %9 : vector<256xf32> to vector<1x256xf32>
    %91 = vector.broadcast %90 : vector<1x256xf32> to vector<16x256xf32>
    %92 = arith.addf %89, %91 : vector<16x256xf32>
    %93 = arith.truncf %92 : vector<16x256xf32> to vector<16x256xbf16>
    %c0_34 = arith.constant 0 : index
    %c0_35 = arith.constant 0 : index
    %94 = vector.load %arg8[%c0_34, %c0_35] : memref<256x1024xbf16, #tpu.memory_space<vmem>>, vector<256x1024xbf16>
    %cst_36 = arith.constant dense<0.000000e+00> : vector<16x1024xf32>
    %95 = tpu.matmul %93, %94, %cst_36 {dimension_numbers = #tpu.dot_dimension_numbers<[1], [0], [0], [1], [0, 0, 1, 1], [], []>} : vector<16x256xbf16>, vector<256x1024xbf16>, vector<16x1024xf32> -> vector<16x1024xf32>
    %c0_37 = arith.constant 0 : index
    %c0_38 = arith.constant 0 : index
    %96 = vector.load %arg9[%c0_37, %c0_38] : memref<1x1024xf32, #tpu.memory_space<vmem>>, vector<1x1024xf32>
    %97 = vector.shape_cast %96 : vector<1x1024xf32> to vector<1024xf32>
    %98 = vector.shape_cast %97 : vector<1024xf32> to vector<1x1024xf32>
    %99 = vector.broadcast %98 : vector<1x1024xf32> to vector<16x1024xf32>
    %100 = arith.addf %95, %99 : vector<16x1024xf32>
    %101 = arith.mulf %100, %100 : vector<16x1024xf32>
    %102 = arith.mulf %100, %101 : vector<16x1024xf32>
    %cst_39 = arith.constant 4.471500e-02 : f32
    %103 = vector.broadcast %cst_39 : f32 to vector<16x1024xf32>
    %104 = arith.mulf %103, %102 : vector<16x1024xf32>
    %105 = arith.addf %100, %104 : vector<16x1024xf32>
    %cst_40 = arith.constant 0.797884583 : f32
    %106 = vector.broadcast %cst_40 : f32 to vector<16x1024xf32>
    %107 = arith.mulf %106, %105 : vector<16x1024xf32>
    %108 = math.tanh %107 : vector<16x1024xf32>
    %cst_41 = arith.constant 1.000000e+00 : f32
    %109 = vector.broadcast %cst_41 : f32 to vector<16x1024xf32>
    %110 = arith.addf %109, %108 : vector<16x1024xf32>
    %cst_42 = arith.constant 5.000000e-01 : f32
    %111 = vector.broadcast %cst_42 : f32 to vector<16x1024xf32>
    %112 = arith.mulf %111, %110 : vector<16x1024xf32>
    %113 = arith.mulf %100, %112 : vector<16x1024xf32>
    %114 = arith.truncf %113 : vector<16x1024xf32> to vector<16x1024xbf16>
    %c0_43 = arith.constant 0 : index
    %c0_44 = arith.constant 0 : index
    %115 = vector.load %arg10[%c0_43, %c0_44] : memref<1024x256xbf16, #tpu.memory_space<vmem>>, vector<1024x256xbf16>
    %cst_45 = arith.constant dense<0.000000e+00> : vector<16x256xf32>
    %116 = tpu.matmul %114, %115, %cst_45 {dimension_numbers = #tpu.dot_dimension_numbers<[1], [0], [0], [1], [0, 0, 1, 1], [], []>} : vector<16x1024xbf16>, vector<1024x256xbf16>, vector<16x256xf32> -> vector<16x256xf32>
    %117 = vector.shape_cast %11 : vector<256xf32> to vector<1x256xf32>
    %118 = vector.broadcast %117 : vector<1x256xf32> to vector<16x256xf32>
    %119 = arith.addf %116, %118 : vector<16x256xf32>
    %120 = arith.addf %68, %119 : vector<16x256xf32>
    %cst_46 = arith.constant dense<0.000000e+00> : vector<16xf32>
    %121 = vector.multi_reduction <add>, %120, %cst_46 [1] : vector<16x256xf32> to vector<16xf32>
    %122 = vector.shape_cast %121 : vector<16xf32> to vector<16x1xf32>
    %cst_47 = arith.constant 2.560000e+02 : f32
    %123 = vector.broadcast %cst_47 : f32 to vector<16x1xf32>
    %124 = arith.divf %122, %123 : vector<16x1xf32>
    %125 = vector.broadcast %124 : vector<16x1xf32> to vector<16x256xf32>
    %126 = arith.subf %120, %125 : vector<16x256xf32>
    %127 = arith.mulf %126, %126 : vector<16x256xf32>
    %cst_48 = arith.constant dense<0.000000e+00> : vector<16xf32>
    %128 = vector.multi_reduction <add>, %127, %cst_48 [1] : vector<16x256xf32> to vector<16xf32>
    %129 = vector.shape_cast %128 : vector<16xf32> to vector<16x1xf32>
    %cst_49 = arith.constant 2.560000e+02 : f32
    %130 = vector.broadcast %cst_49 : f32 to vector<16x1xf32>
    %131 = arith.divf %129, %130 : vector<16x1xf32>
    %132 = vector.broadcast %124 : vector<16x1xf32> to vector<16x256xf32>
    %133 = arith.subf %120, %132 : vector<16x256xf32>
    %cst_50 = arith.constant 9.99999974E-6 : f32
    %134 = vector.broadcast %cst_50 : f32 to vector<16x1xf32>
    %135 = arith.addf %131, %134 : vector<16x1xf32>
    %136 = math.rsqrt %135 : vector<16x1xf32>
    %137 = vector.broadcast %136 : vector<16x1xf32> to vector<16x256xf32>
    %138 = arith.mulf %133, %137 : vector<16x256xf32>
    %139 = arith.truncf %138 : vector<16x256xf32> to vector<16x256xbf16>
    %c0_51 = arith.constant 0 : index
    %c0_52 = arith.constant 0 : index
    %140 = vector.load %arg11[%c0_51, %c0_52] : memref<256x128xbf16, #tpu.memory_space<vmem>>, vector<256x128xbf16>
    %cst_53 = arith.constant dense<0.000000e+00> : vector<16x128xf32>
    %141 = tpu.matmul %139, %140, %cst_53 {dimension_numbers = #tpu.dot_dimension_numbers<[1], [0], [0], [1], [0, 0, 1, 1], [], []>} : vector<16x256xbf16>, vector<256x128xbf16>, vector<16x128xf32> -> vector<16x128xf32>
    %c0_54 = arith.constant 0 : index
    %c0_55 = arith.constant 0 : index
    %142 = vector.load %arg12[%c0_54, %c0_55] : memref<1x128xf32, #tpu.memory_space<vmem>>, vector<1x128xf32>
    %143 = vector.shape_cast %142 : vector<1x128xf32> to vector<128xf32>
    %144 = vector.shape_cast %143 : vector<128xf32> to vector<1x128xf32>
    %145 = vector.broadcast %144 : vector<1x128xf32> to vector<16x128xf32>
    %146 = arith.addf %141, %145 : vector<16x128xf32>
    %c0_56 = arith.constant 0 : index
    %c0_57 = arith.constant 0 : index
    %147 = vector.load %arg13[%c0_56, %c0_57] : memref<16x128xf32, #tpu.memory_space<vmem>>, vector<16x128xf32>
    tpu.vector_store %arg13[%c0_56, %c0_57], %146 {strides = array<i32>} : memref<16x128xf32, #tpu.memory_space<vmem>>, vector<16x128xf32>,
    return
  }
  func.func @transform_0(%arg0: i32) -> (i32, i32) {
    %c0_i32 = arith.constant 0 : i32
    %c0_i32_0 = arith.constant 0 : i32
    return %arg0, %c0_i32 : i32, i32
  }
  func.func @transform_1(%arg0: i32) -> (i32, i32) {
    %c0_i32 = arith.constant 0 : i32
    %c0_i32_0 = arith.constant 0 : i32
    %c0_i32_1 = arith.constant 0 : i32
    return %c0_i32, %c0_i32_0 : i32, i32
  }
  func.func @transform_2(%arg0: i32) -> (i32, i32) {
    %c0_i32 = arith.constant 0 : i32
    %c0_i32_0 = arith.constant 0 : i32
    %c0_i32_1 = arith.constant 0 : i32
    return %c0_i32, %c0_i32_0 : i32, i32
  }
  func.func @transform_3(%arg0: i32) -> (i32, i32) {
    %c0_i32 = arith.constant 0 : i32
    %c0_i32_0 = arith.constant 0 : i32
    %c0_i32_1 = arith.constant 0 : i32
    return %c0_i32, %c0_i32_0 : i32, i32
  }
  func.func @transform_4(%arg0: i32) -> (i32, i32) {
    %c0_i32 = arith.constant 0 : i32
    %c0_i32_0 = arith.constant 0 : i32
    %c0_i32_1 = arith.constant 0 : i32
    return %c0_i32, %c0_i32_0 : i32, i32
  }
  func.func @transform_5(%arg0: i32) -> (i32, i32) {
    %c0_i32 = arith.constant 0 : i32
    %c0_i32_0 = arith.constant 0 : i32
    %c0_i32_1 = arith.constant 0 : i32
    return %c0_i32, %c0_i32_0 : i32, i32
  }
  func.func @transform_6(%arg0: i32) -> (i32, i32) {
    %c0_i32 = arith.constant 0 : i32
    %c0_i32_0 = arith.constant 0 : i32
    %c0_i32_1 = arith.constant 0 : i32
    return %c0_i32, %c0_i32_0 : i32, i32
  }
  func.func @transform_7(%arg0: i32) -> (i32, i32) {
    %c0_i32 = arith.constant 0 : i32
    %c0_i32_0 = arith.constant 0 : i32
    %c0_i32_1 = arith.constant 0 : i32
    return %c0_i32, %c0_i32_0 : i32, i32
  }
  func.func @transform_8(%arg0: i32) -> (i32, i32) {
    %c0_i32 = arith.constant 0 : i32
    %c0_i32_0 = arith.constant 0 : i32
    %c0_i32_1 = arith.constant 0 : i32
    return %c0_i32, %c0_i32_0 : i32, i32
  }
  func.func @transform_9(%arg0: i32) -> (i32, i32) {
    %c0_i32 = arith.constant 0 : i32
    %c0_i32_0 = arith.constant 0 : i32
    %c0_i32_1 = arith.constant 0 : i32
    return %c0_i32, %c0_i32_0 : i32, i32
  }
  func.func @transform_10(%arg0: i32) -> (i32, i32) {
    %c0_i32 = arith.constant 0 : i32
    %c0_i32_0 = arith.constant 0 : i32
    %c0_i32_1 = arith.constant 0 : i32
    return %c0_i32, %c0_i32_0 : i32, i32
  }
  func.func @transform_11(%arg0: i32) -> (i32, i32) {
    %c0_i32 = arith.constant 0 : i32
    %c0_i32_0 = arith.constant 0 : i32
    %c0_i32_1 = arith.constant 0 : i32
    return %c0_i32, %c0_i32_0 : i32, i32
  }
  func.func @transform_12(%arg0: i32) -> (i32, i32) {
    %c0_i32 = arith.constant 0 : i32
    %c0_i32_0 = arith.constant 0 : i32
    return %arg0, %c0_i32 : i32, i32
  }
}

</mosaic_0001>

<bundles_post_ra>
// kernel: temporal_smpl_shape_regressor.1
= control target key start
LH: loop header
LB: loop body
LE: loop exit
PB: predicated region body
PF: predicated region fallthrough
CT: control target
= control target key end

     0   :  { %v3704_v2 = vmov 0   ;;  %s5055_s0 = inlined_call_operand.vmem [shape: f32[16,128], index: 0, kind: input, shape index: {}]   ;;  %s5056_s1 = inlined_call_operand.vmem [shape: bf16[128,256], index: 1, kind: input, shape index: {}]   ;;  %s5057_s2 = inlined_call_operand.vmem [shape: f32[6,256], index: 2, kind: input, shape index: {}]   ;;  %s5058_s3 = inlined_call_operand.vmem [shape: bf16[64,16], index: 3, kind: input, shape index: {}]   ;;  %s5059_s4 = inlined_call_operand.vmem [shape: f32[64,1], index: 4, kind: input, shape index: {}]   ;;  %s5060_s5 = inlined_call_operand.vmem [shape: bf16[16,64], index: 5, kind: input, shape index: {}]   ;;  %s5061_s6 = inlined_call_operand.vmem [shape: f32[16,1], index: 6, kind: input, shape index: {}]   ;;  %s5062_s7 = inlined_call_operand.vmem [shape: bf16[256,1024], index: 7, kind: input, shape index: {}]   ;;  %s5063_s8 = inlined_call_operand.vmem [shape: f32[1,1024], index: 8, kind: input, shape index: {}]   ;;  %s5064_s9 = inlined_call_operand.vmem [shape: bf16[1024,256], index: 9, kind: input, shape index: {}]   ;;  %s5065_s10 = inlined_call_operand.vmem [shape: bf16[256,128], index: 10, kind: input, shape index: {}]   ;;  %s5066_s11 = inlined_call_operand.vmem [shape: f32[1,128], index: 11, kind: input, shape index: {}]   ;;  %s5067_s12 = inlined_call_operand.hbm [shape: f32[16,128], index: 12, kind: output, shape index: {}]  }
   0x1   :  { %v3369_v0 = vld [vmem:[%s5056_s1 + $0x74] ss:$8 sps:$4 sm:$0xff]   ;;  %v3371_v1 = vld [vmem:[%s5056_s1 + $0x70] ss:$8 sps:$4 sm:$0xff]   ;;  %196 = vmatprep.mubr.bf16.mxu0 %v3704_v2  ;;  %393 = vmatprep.mubr.bf16.mxu1 %v3704_v2  ;;  %v3372_v3 = vld [vmem:[%s5056_s1 + $0x64] ss:$8 sps:$4 sm:$0xff]  }
   0x2   :  { %164 = vmatprep.subr.bf16.mxu0 %v3369_v0  ;;  %3368 = vset.pattern.permute.xlu1 %v3704_v2  ;;  %v3374_v4 = vld [vmem:[%s5056_s1 + $0x60] ss:$8 sps:$4 sm:$0xff]   ;;  %v3375_v5 = vld [vmem:[%s5056_s1 + $0x54] ss:$8 sps:$4 sm:$0xff]   ;;  %v3377_v6 = vld [vmem:[%s5056_s1 + $0x50] ss:$8 sps:$4 sm:$0xff]  }
   0x3   :  { %165 = vmatpush1.bf16.msra.mxu0 %v3371_v1  ;;  %3367 = vset.pattern.permute.xlu0 %v3704_v2  ;;  %v3378_v7 = vld [vmem:[%s5056_s1 + $0x44] ss:$8 sps:$4 sm:$0xff]   ;;  %v3380_v8 = vld [vmem:[%s5056_s1 + $0x40] ss:$8 sps:$4 sm:$0xff]   ;;  %v3381_v9 = vld [vmem:[%s5056_s1 + $0x34] ss:$8 sps:$4 sm:$0xff]  }
   0x4   :  { %166 = vmatprep.subr.bf16.mxu0 %v3372_v3  ;;  %v3383_v10 = vld [vmem:[%s5056_s1 + $0x30] ss:$8 sps:$4 sm:$0xff]   ;;  %v3384_v11 = vld [vmem:[%s5056_s1 + $0x24] ss:$8 sps:$4 sm:$0xff]   ;;  %v3386_v12 = vld [vmem:[%s5056_s1 + $0x20] ss:$8 sps:$4 sm:$0xff]  }
   0x5   :  { %v3387_v13 = vld [vmem:[%s5056_s1 + $0x14] ss:$8 sps:$4 sm:$0xff]   ;;  %v3389_v14 = vld [vmem:[%s5056_s1 + $0x10] ss:$8 sps:$4 sm:$0xff]   ;;  %v3390_v15 = vld [vmem:[%s5056_s1 + $0x4] ss:$8 sps:$4 sm:$0xff]  }
   0x6   :  { %v3392_v16 = vld [vmem:[%s5056_s1] ss:$8 sps:$4 sm:$0xff]  }
   0x7   :  { %167 = vmatpush1.bf16.msra.mxu0 %v3374_v4  ;;  %v54_v17 = vld [vmem:[%s5055_s0] sm:$0xff]  ;;  %v55_v18 = vld [vmem:[%s5055_s0 + $0x8] sm:$0xff] }
   0x8   :  { %168 = vmatprep.subr.bf16.mxu0 %v3375_v5  ;;  %v56_v19 = vpack.c.bf16 %v55_v18, %v54_v17 }
   0xb   :  { %169 = vmatpush1.bf16.msra.mxu0 %v3377_v6 }
   0xc   :  { %170 = vmatprep.subr.bf16.mxu0 %v3378_v7 }
   0xf   :  { %171 = vmatpush1.bf16.msra.mxu0 %v3380_v8 }
  0x10   :  { %172 = vmatprep.subr.bf16.mxu0 %v3381_v9 }
  0x13   :  { %173 = vmatpush1.bf16.msra.mxu0 %v3383_v10 }
  0x14   :  { %174 = vmatprep.subr.bf16.mxu0 %v3384_v11 }
  0x17   :  { %175 = vmatpush1.bf16.msra.mxu0 %v3386_v12 }
  0x18   :  { %176 = vmatprep.subr.bf16.mxu0 %v3387_v13 }
  0x1b   :  { %177 = vmatpush1.bf16.msra.mxu0 %v3389_v14 }
  0x1c   :  { %178 = vmatprep.subr.bf16.mxu0 %v3390_v15 }
  0x1f   :  { %179 = vmatpush1.bf16.msra.mxu0 %v3392_v16 }
  0x22   :  { %197 = vmatmul.mubr.bf16.vlgmr.msra.gmra.mxu0 %v56_v19 }
  0x23   :  { %17 = vsyncpa [#allocation3], 0  ;;  %v74_v20 = vlaneseq  ;;  %v43_v24 = vld [vmem:[%s5057_s2] ss:$8 sm:$0x3]  ;;  %v287_v51 = vld [vmem:[%s5059_s4 + $0x38] sm:$0xff] }
  0x24   :  { %v284_v52 = vld [vmem:[%s5059_s4 + $0x20] sm:$0xff]  ;;  %v286_v53 = vld [vmem:[%s5059_s4 + $0x30] sm:$0xff]  ;;  %v589_v54 = vld [vmem:[%s5061_s6 + $0x8] sm:$0xff]  ;;  %vm348_vm0 = vcmask 130048   ;;  %vm605_vm1 = vcmask 523264   ;;  %s3705_s16 = smov [#allocation2]  }
  0x25   :  { %v3831_v21 = vshrl.u32 %v74_v20, 7  ;;  %v285_v55 = vld [vmem:[%s5059_s4 + $0x28] sm:$0xff]  ;;  %v282_v56 = vld [vmem:[%s5059_s4 + $0x10] sm:$0xff]  ;;  %v283_v57 = vld [vmem:[%s5059_s4 + $0x18] sm:$0xff] }
  0x26   :  { %v280_v58 = vld [vmem:[%s5059_s4] sm:$0xff]  ;;  %v281_v59 = vld [vmem:[%s5059_s4 + $0x8] sm:$0xff] }
  0x27   :  { %v3834_v22 = vsub.s32 0, %v3831_v21  ;;  %v3837_v23 = vsub.s32 1, %v3831_v21  ;;  %v588_v60 = vld [vmem:[%s5061_s6] sm:$0xff] }
  0x28   :  { %v3037_v4 = vld [vmem:[%s5057_s2 + $0x1] ss:$8 sm:$0x3]  ;;  %v3038_v6 = vld [vmem:[%s5057_s2 + $0x2] ss:$8 sm:$0x3] }
  0x29   :  { %v77_v25 = vrot.slane %v43_v24, %v3834_v22  ;;  %v81_v26 = vrot.slane %v43_v24, %v3837_v23  ;;  %v248_v8 = vrot.slane %v3037_v4, %v3837_v23  ;;  %v244_v10 = vrot.slane %v3037_v4, %v3834_v22 }
  0x2a   :  { %v263_v12 = vrot.slane %v3038_v6, %v3837_v23  ;;  %v259_v13 = vrot.slane %v3038_v6, %v3834_v22 }
  0xe2   :  { %v198_v27 = vpop.f32.mrf.mxu0 }
  0xe3   :  { %v3844_v29 = vadd.f32 %v198_v27, %v77_v25 }
  0xe4   :  { %v200_v28 = vpop.f32.mrf.mxu0 }
  0xe5   :  { %v3846_v30 = vadd.f32 %v200_v28, %v81_v26 }
  0xe6   :  { %v202_v31 = vpop.f32.mrf.mxu0 }
  0xe7   :  { %v207_v32 = vadd.f32 %v3846_v30, %v3844_v29  ;;  %v3850_v34 = vadd.f32 %v202_v31, %v77_v25  ;;  %v3393_v31 = vld [vmem:[%s5058_s3] sm:$0xff]  }
  0xe8   :  { %v204_v33 = vpop.f32.mrf.mxu0 }
  0xe9   :  { %v3852_v35 = vadd.f32 %v204_v33, %v81_v26  ;;  %208 = vadd.xlane.f32.xlu0 %v207_v32  ;;  %v3394_v32 = vld [vmem:[%s5058_s3 + $0x8] sm:$0xff]   ;;  %v3395_v33 = vld [vmem:[%s5058_s3 + $0x10] sm:$0xff]  }
  0xeb   :  { %v210_v36 = vadd.f32 %v3852_v35, %v3850_v34 }
  0xed   :  { %211 = vadd.xlane.f32.xlu0 %v210_v36  ;;  %v3396_v36 = vld [vmem:[%s5058_s3 + $0x18] sm:$0xff]  }
 0x103   :  { %320 = vperm.xlu0 %3367, %v286_v53  }
 0x107   :  { %597 = vperm.xlu0 %3367, %v589_v54  }
 0x172   :  { %v209_v37 = vpop.xlane.xlu0 %208 }
 0x173   :  { %v214_v38 = vmul.f32 0.00390625, %v209_v37 }
 0x175   :  { %v216_v39 = vsub.f32 %v3844_v29, %v214_v38  ;;  %v217_v40 = vsub.f32 %v3846_v30, %v214_v38 }
 0x176   :  { %v212_v41 = vpop.xlane.xlu0 %211 }
 0x177   :  { %v215_v42 = vmul.f32 0.00390625, %v212_v41  ;;  %v220_v43 = vmul.f32 %v216_v39, %v216_v39  ;;  %v221_v44 = vmul.f32 %v217_v40, %v217_v40 }
 0x179   :  { %v218_v45 = vsub.f32 %v3850_v34, %v215_v42  ;;  %v219_v46 = vsub.f32 %v3852_v35, %v215_v42  ;;  %v224_v47 = vadd.f32 %v221_v44, %v220_v43 }
 0x17b   :  { %225 = vadd.xlane.f32.xlu1 %v224_v47  ;;  %v222_v48 = vmul.f32 %v218_v45, %v218_v45  ;;  %v223_v49 = vmul.f32 %v219_v46, %v219_v46 }
 0x17d   :  { %v227_v50 = vadd.f32 %v223_v49, %v222_v48 }
 0x17f   :  { %228 = vadd.xlane.f32.xlu1 %v227_v50 }
 0x190   :  { %325 = vperm.xlu1 %3368, %v287_v51  }
 0x194   :  { %310 = vperm.xlu1 %3368, %v284_v52  }
 0x198   :  { %315 = vperm.xlu1 %3368, %v285_v55  }
 0x19c   :  { %300 = vperm.xlu1 %3368, %v282_v56  }
 0x1a0   :  { %305 = vperm.xlu1 %3368, %v283_v57  }
 0x1a4   :  { %290 = vperm.xlu1 %3368, %v280_v58  }
 0x1a8   :  { %295 = vperm.xlu1 %3368, %v281_v59  }
 0x1ac   :  { %592 = vperm.xlu1 %3368, %v588_v60  }
 0x204   :  { %v226_v61 = vpop.xlane.xlu1 %225 }
 0x205   :  { %v230_v62 = vmul.f32 0.00390625, %v226_v61 }
 0x207   :  { %v232_v63 = vadd.f32 1e-05, %v230_v62 }
 0x208   :  { %v229_v0 = vpop.xlane.xlu1 %228 }
 0x209   :  { %3606 = vrsqrt.f32 %v232_v63  ;;  %v231_v1 = vmul.f32 0.00390625, %v229_v0 }
 0x20b   :  { %v233_v3 = vadd.f32 1e-05, %v231_v1 }
 0x20c   :  { %v3916_v37 = vpop.permute.xlu1 %325 }
 0x20d   :  { %3608 = vrsqrt.f32 %v233_v3 }
 0x210   :  { %v311_v38 = vpop.permute.xlu1 %310 }
 0x216   :  { %v3607_v5 = vpop.eup %3606 }
 0x217   :  { %v237_v7 = vmul.f32 %v3607_v5, %v217_v40  ;;  %v236_v9 = vmul.f32 %v3607_v5, %v216_v39  ;;  %v316_v39 = vpop.permute.xlu1 %315 }
 0x219   :  { %v252_v15 = vmul.f32 %v248_v8, %v237_v7  ;;  %v251_v17 = vmul.f32 %v244_v10, %v236_v9 }
 0x21a   :  { %v3609_v11 = vpop.eup %3608 }
 0x21b   :  { %v239_v14 = vmul.f32 %v3609_v11, %v219_v46  ;;  %v238_v16 = vmul.f32 %v3609_v11, %v218_v45  ;;  %v267_v20 = vadd.f32 %v263_v12, %v252_v15  ;;  %v266_v25 = vadd.f32 %v259_v13, %v251_v17  ;;  %v301_v40 = vpop.permute.xlu1 %300 }
 0x21d   :  { %v254_v18 = vmul.f32 %v248_v8, %v239_v14  ;;  %v253_v19 = vmul.f32 %v244_v10, %v238_v16 }
 0x21f   :  { %v269_v24 = vadd.f32 %v263_v12, %v254_v18  ;;  %v268_v26 = vadd.f32 %v259_v13, %v253_v19  ;;  %v306_v41 = vpop.permute.xlu1 %305 }
 0x221   :  { %v271_v27 = vpack.c.bf16 %v269_v24, %v267_v20  ;;  %v270_v28 = vpack.c.bf16 %v268_v26, %v266_v25 }
 0x223   :  { %375 = vmatprep.subr.bf16.mxu1 %v271_v27  ;;  %v291_v43 = vpop.permute.xlu1 %290  ;;  %v321_v27 = vpop.permute.xlu0 %320 }
 0x224   :  { %376 = vmatpush1.bf16.msra.mxu1 %v270_v28 }
 0x227   :  { %3062 = vmatmul.mubr.msk.bf16.vlgmr.msra.gmra.mxu1 %vm348_vm0, %v3393_v31  ;;  %v296_v46 = vpop.permute.xlu1 %295 }
 0x228   :  { %403 = vmatprep.mubr.bf16.mxu1 %v3704_v2 }
 0x22f   :  { %3063 = vmatmul.mubr.msk.bf16.gmra.mxu1 %vm348_vm0, %v3394_v32 }
 0x230   :  { %413 = vmatprep.mubr.bf16.mxu1 %v3704_v2 }
 0x237   :  { %3064 = vmatmul.mubr.msk.bf16.gmra.mxu1 %vm348_vm0, %v3395_v33 }
 0x238   :  { %423 = vmatprep.mubr.bf16.mxu1 %v3704_v2 }
 0x23f   :  { %3065 = vmatmul.mubr.msk.bf16.gmra.mxu1 %vm348_vm0, %v3396_v36 }
 0x240   :  { %641 = vmatprep.mubr.bf16.mxu1 %v3704_v2 }
 0x2e7   :  { %v395_v42 = vpop.f32.mrf.mxu1 }
 0x2e8   :  { %v3933_v59 = vadd.f32 %v395_v42, %v291_v43 }
 0x2e9   :  { %v397_v44 = vpop.f32.mrf.mxu1 }
 0x2ea   :  { %v3925_v54 = vadd.f32 %v397_v44, %v291_v43  ;;  %v434_v9 = vmul.f32 %v3933_v59, %v3933_v59 }
 0x2eb   :  { %v399_v45 = vpop.f32.mrf.mxu1 }
 0x2ec   :  { %v3927_v55 = vadd.f32 %v399_v45, %v296_v46  ;;  %v435_v1 = vmul.f32 %v3925_v54, %v3925_v54  ;;  %v450_v28 = vmul.f32 %v434_v9, %v3933_v59 }
 0x2ed   :  { %v401_v47 = vpop.f32.mrf.mxu1 }
 0x2ee   :  { %v3918_v48 = vadd.f32 %v401_v47, %v296_v46  ;;  %v436_v3 = vmul.f32 %v3927_v55, %v3927_v55  ;;  %v451_v16 = vmul.f32 %v435_v1, %v3925_v54 }
 0x2ef   :  { %v405_v49 = vpop.f32.mrf.mxu1 }
 0x2f0   :  { %v437_v50 = vmul.f32 %v3918_v48, %v3918_v48  ;;  %v3946_v6 = vadd.f32 %v405_v49, %v301_v40  ;;  %v452_v17 = vmul.f32 %v436_v3, %v3927_v55  ;;  %v467_v42 = vmul.f32 0.044715, %v451_v16 }
 0x2f1   :  { %v407_v51 = vpop.f32.mrf.mxu1 }
 0x2f2   :  { %v453_v2 = vmul.f32 %v437_v50, %v3918_v48  ;;  %v3923_v52 = vadd.f32 %v407_v51, %v301_v40  ;;  %v438_v20 = vmul.f32 %v3946_v6, %v3946_v6  ;;  %v468_v47 = vmul.f32 0.044715, %v452_v17 }
 0x2f3   :  { %v409_v53 = vpop.f32.mrf.mxu1 }
 0x2f4   :  { %v439_v56 = vmul.f32 %v3923_v52, %v3923_v52  ;;  %v469_v60 = vmul.f32 0.044715, %v453_v2  ;;  %v3936_v63 = vadd.f32 %v409_v53, %v306_v41 }
 0x2f5   :  { %v411_v57 = vpop.f32.mrf.mxu1 }
 0x2f6   :  { %v3931_v58 = vadd.f32 %v411_v57, %v306_v41  ;;  %v455_v62 = vmul.f32 %v439_v56, %v3923_v52  ;;  %v485_v10 = vadd.f32 %v469_v60, %v3918_v48  ;;  %v440_v13 = vmul.f32 %v3936_v63, %v3936_v63 }
 0x2f7   :  { %v415_v61 = vpop.f32.mrf.mxu1 }
 0x2f8   :  { %v441_v0 = vmul.f32 %v3931_v58, %v3931_v58  ;;  %v3944_v4 = vadd.f32 %v415_v61, %v311_v38  ;;  %v471_v12 = vmul.f32 0.044715, %v455_v62  ;;  %v501_v31 = vmul.f32 0.7978846, %v485_v10 }
 0x2f9   :  { %v417_v5 = vpop.f32.mrf.mxu1 }
 0x2fa   :  { %v457_v7 = vmul.f32 %v441_v0, %v3931_v58  ;;  %v3949_v8 = vadd.f32 %v417_v5, %v311_v38  ;;  %v442_v18 = vmul.f32 %v3944_v4, %v3944_v4  ;;  %v487_v36 = vadd.f32 %v471_v12, %v3923_v52 }
 0x2fb   :  { %v419_v11 = vpop.f32.mrf.mxu1  ;;  %v456_v38 = vmul.f32 %v440_v13, %v3936_v63  ;;  %3610 = vtanh.f32 %v501_v31 }
 0x2fc   :  { %v443_v14 = vmul.f32 %v3949_v8, %v3949_v8  ;;  %v3958_v15 = vadd.f32 %v419_v11, %v316_v39  ;;  %v473_v24 = vmul.f32 0.044715, %v457_v7  ;;  %v458_v43 = vmul.f32 %v442_v18, %v3944_v4 }
 0x2fd   :  { %v421_v19 = vpop.f32.mrf.mxu1  ;;  %v503_v60 = vmul.f32 0.7978846, %v487_v36  ;;  %v472_v61 = vmul.f32 0.044715, %v456_v38 }
 0x2fe   :  { %v459_v25 = vmul.f32 %v443_v14, %v3949_v8  ;;  %v444_v26 = vmul.f32 %v3958_v15, %v3958_v15  ;;  %v3970_v32 = vadd.f32 %v421_v19, %v316_v39  ;;  %v454_v39 = vmul.f32 %v438_v20, %v3946_v6 }
 0x2ff   :  { %v425_v33 = vpop.f32.mrf.mxu1  ;;  %v489_v49 = vadd.f32 %v473_v24, %v3931_v58  ;;  %v474_v0 = vmul.f32 0.044715, %v458_v43  ;;  %3612 = vtanh.f32 %v503_v60  ;;  %v488_v36 = vadd.f32 %v472_v61, %v3936_v63 }
 0x300   :  { %v475_v40 = vmul.f32 0.044715, %v459_v25  ;;  %v460_v41 = vmul.f32 %v444_v26, %v3958_v15  ;;  %v445_v44 = vmul.f32 %v3970_v32, %v3970_v32  ;;  %v3978_v45 = vadd.f32 %v425_v33, %v321_v27 }
 0x301   :  { %v427_v46 = vpop.f32.mrf.mxu1  ;;  %v505_v9 = vmul.f32 0.7978846, %v489_v49  ;;  %v470_v18 = vmul.f32 0.044715, %v454_v39  ;;  %v490_v24 = vadd.f32 %v474_v0, %v3944_v4 }
 0x302   :  { %v476_v50 = vmul.f32 0.044715, %v460_v41  ;;  %v491_v51 = vadd.f32 %v475_v40, %v3949_v8  ;;  %v461_v2 = vmul.f32 %v445_v44, %v3970_v32  ;;  %v446_v53 = vmul.f32 %v3978_v45, %v3978_v45 }
 0x303   :  { %v3986_v56 = vadd.f32 %v427_v46, %v321_v27  ;;  %v429_v57 = vpop.f32.mrf.mxu1  ;;  %3614 = vtanh.f32 %v505_v9  ;;  %v466_v41 = vmul.f32 0.044715, %v450_v28  ;;  %v486_v46 = vadd.f32 %v470_v18, %v3946_v6 }
 0x304   :  { %v3989_v62 = vadd.f32 %v429_v57, %v3916_v37  ;;  %v477_v1 = vmul.f32 0.044715, %v461_v2  ;;  %v462_v3 = vmul.f32 %v446_v53, %v3978_v45  ;;  %v492_v10 = vadd.f32 %v476_v50, %v3958_v15 }
 0x305   :  { %v447_v5 = vmul.f32 %v3986_v56, %v3986_v56  ;;  %v431_v7 = vpop.f32.mrf.mxu1  ;;  %v507_v13 = vmul.f32 0.7978846, %v491_v51  ;;  %v506_v39 = vmul.f32 0.7978846, %v490_v24  ;;  %v483_v50 = vadd.f32 %v467_v42, %v3925_v54 }
 0x306   :  { %v448_v11 = vmul.f32 %v3989_v62, %v3989_v62  ;;  %v3998_v12 = vadd.f32 %v431_v7, %v3916_v37  ;;  %v493_v14 = vadd.f32 %v477_v1, %v3970_v32  ;;  %v478_v16 = vmul.f32 0.044715, %v462_v3 }
 0x307   :  { %v463_v17 = vmul.f32 %v447_v5, %v3986_v56  ;;  %v508_v27 = vmul.f32 0.7978846, %v492_v10  ;;  %3616 = vtanh.f32 %v507_v13  ;;  %v484_v53 = vadd.f32 %v468_v47, %v3927_v55 }
 0x308   :  { %v464_v19 = vmul.f32 %v448_v11, %v3989_v62  ;;  %v449_v20 = vmul.f32 %v3998_v12, %v3998_v12  ;;  %v509_v25 = vmul.f32 0.7978846, %v493_v14  ;;  %v494_v26 = vadd.f32 %v478_v16, %v3978_v45  ;;  %v3611_v60 = vpop.eup %3610 }
 0x309   :  { %v479_v37 = vmul.f32 0.044715, %v463_v17  ;;  %v504_v57 = vmul.f32 0.7978846, %v488_v36  ;;  %v482_v61 = vadd.f32 %v466_v41, %v3933_v59  ;;  %v502_v0 = vmul.f32 0.7978846, %v486_v46 }
 0x30a   :  { %v480_v31 = vmul.f32 0.044715, %v464_v19  ;;  %v465_v33 = vmul.f32 %v449_v20, %v3998_v12  ;;  %v510_v38 = vmul.f32 0.7978846, %v494_v26  ;;  %3618 = vtanh.f32 %v509_v25 }
 0x30b   :  { %v495_v40 = vadd.f32 %v479_v37, %v3986_v56  ;;  %v499_v1 = vmul.f32 0.7978846, %v483_v50  ;;  %v500_v3 = vmul.f32 0.7978846, %v484_v53  ;;  %v498_v5 = vmul.f32 0.7978846, %v482_v61 }
 0x30c   :  { %v496_v43 = vadd.f32 %v480_v31, %v3989_v62  ;;  %v481_v44 = vmul.f32 0.044715, %v465_v33  ;;  %3620 = vtanh.f32 %v510_v38  ;;  %v3613_v42 = vpop.eup %3612  ;;  %v533_v53 = vadd.f32 1.0, %v3611_v60 }
 0x30d   :  { %v511_v49 = vmul.f32 0.7978846, %v495_v40  ;;  %3622 = vtanh.f32 %v508_v27 }
 0x30e   :  { %v512_v51 = vmul.f32 0.7978846, %v496_v43  ;;  %v497_v2 = vadd.f32 %v481_v44, %v3998_v12 }
 0x30f   :  { %3624 = vtanh.f32 %v511_v49 }
 0x310   :  { %3626 = vtanh.f32 %v512_v51  ;;  %v513_v28 = vmul.f32 0.7978846, %v497_v2  ;;  %v3615_v7 = vpop.eup %3614 }
 0x311   :  { %3628 = vtanh.f32 %v506_v39  ;;  %v537_v37 = vadd.f32 1.0, %v3615_v7  ;;  %v535_v39 = vadd.f32 1.0, %v3613_v42 }
 0x312   :  { %3630 = vtanh.f32 %v513_v28 }
 0x313   :  { %3632 = vtanh.f32 %v504_v57 }
 0x314   :  { %3634 = vtanh.f32 %v502_v0  ;;  %v3617_v47 = vpop.eup %3616 }
 0x315   :  { %3636 = vtanh.f32 %v499_v1  ;;  %v539_v24 = vadd.f32 1.0, %v3617_v47  ;;  %v553_v1 = vmul.f32 0.5, %v537_v37 }
 0x316   :  { %3638 = vtanh.f32 %v500_v3 }
 0x317   :  { %v3619_v9 = vpop.eup %3618  ;;  %3640 = vtanh.f32 %v498_v5  ;;  %v555_v46 = vmul.f32 0.5, %v539_v24 }
 0x318   :  { %v541_v14 = vadd.f32 1.0, %v3619_v9 }
 0x319   :  { %v3621_v10 = vpop.eup %3620  ;;  %v571_v9 = vmul.f32 %v555_v46, %v3949_v8 }
 0x31a   :  { %v3623_v11 = vpop.eup %3622  ;;  %v542_v18 = vadd.f32 1.0, %v3621_v10  ;;  %v557_v38 = vmul.f32 0.5, %v541_v14  ;;  %v551_v10 = vmul.f32 0.5, %v535_v39  ;;  %v549_v14 = vmul.f32 0.5, %v533_v53  ;;  %v781_v53 = vld [vmem:[%s5062_s7 + $0x1e8] sm:$0xff] }
 0x31b   :  { %v540_v26 = vadd.f32 1.0, %v3623_v11 }
 0x31c   :  { %v3625_v13 = vpop.eup %3624  ;;  %v558_v41 = vmul.f32 0.5, %v542_v18  ;;  %v573_v0 = vmul.f32 %v557_v38, %v3970_v32  ;;  %v569_v32 = vmul.f32 %v553_v1, %v3931_v58  ;;  %v567_v8 = vmul.f32 %v551_v10, %v3923_v52  ;;  %v765_v10 = vld [vmem:[%s5062_s7 + $0x168] sm:$0xff] }
 0x31d   :  { %v3627_v16 = vpop.eup %3626  ;;  %v543_v17 = vadd.f32 1.0, %v3625_v13  ;;  %v556_v51 = vmul.f32 0.5, %v540_v26 }
 0x31e   :  { %v3629_v19 = vpop.eup %3628  ;;  %v544_v20 = vadd.f32 1.0, %v3627_v16  ;;  %v574_v7 = vmul.f32 %v558_v41, %v3978_v45  ;;  %v581_v24 = vpack.c.bf16 %v569_v32, %v567_v8  ;;  %v753_v32 = vld [vmem:[%s5062_s7 + $0x108] sm:$0xff] }
 0x31f   :  { %v3631_v25 = vpop.eup %3630  ;;  %v559_v36 = vmul.f32 0.5, %v543_v17  ;;  %v538_v40 = vadd.f32 1.0, %v3629_v19  ;;  %v572_v60 = vmul.f32 %v556_v51, %v3958_v15  ;;  %v780_v51 = vld [vmem:[%s5062_s7 + $0x1e0] sm:$0xff] }
 0x320   :  { %v3633_v27 = vpop.eup %3632  ;;  %v560_v31 = vmul.f32 0.5, %v544_v20  ;;  %v545_v33 = vadd.f32 1.0, %v3631_v25  ;;  %v565_v25 = vmul.f32 %v549_v14, %v3918_v48  ;;  %v3397_v48 = vld [vmem:[%s5060_s5] sm:$0xff]   ;;  %v757_v14 = vld [vmem:[%s5062_s7 + $0x128] sm:$0xff] }
 0x321   :  { %v3635_v43 = vpop.eup %3634  ;;  %v536_v50 = vadd.f32 1.0, %v3633_v27  ;;  %v575_v28 = vmul.f32 %v559_v36, %v3986_v56  ;;  %v554_v5 = vmul.f32 0.5, %v538_v40  ;;  %v598_v40 = vpop.permute.xlu0 %597  ;;  %v3103_v8 = vcombine.high %v753_v32, %v757_v14 }
 0x322   :  { %v561_v44 = vmul.f32 0.5, %v545_v33  ;;  %v3637_v49 = vpop.eup %3636  ;;  %v576_v2 = vmul.f32 %v560_v31, %v3989_v62  ;;  %v534_v3 = vadd.f32 1.0, %v3635_v43 }
 0x323   :  { %v3639_v57 = vpop.eup %3638  ;;  %v531_v11 = vadd.f32 1.0, %v3637_v49  ;;  %v552_v62 = vmul.f32 0.5, %v536_v50  ;;  %v570_v17 = vmul.f32 %v554_v5, %v3944_v4  ;;  %v773_v5 = vld [vmem:[%s5062_s7 + $0x1a8] sm:$0xff] }
 0x324   :  { %v577_v61 = vmul.f32 %v561_v44, %v3998_v12  ;;  %v3641_v47 = vpop.eup %3640  ;;  %v584_v13 = vpack.c.bf16 %v576_v2, %v574_v7  ;;  %v532_v56 = vadd.f32 1.0, %v3639_v57  ;;  %v583_v12 = vpack.c.bf16 %v573_v0, %v571_v9  ;;  %v768_v57 = vld [vmem:[%s5062_s7 + $0x180] sm:$0xff]  ;;  %v761_v9 = vld [vmem:[%s5062_s7 + $0x148] sm:$0xff] }
 0x325   :  { %v550_v16 = vmul.f32 0.5, %v534_v3  ;;  %v530_v45 = vadd.f32 1.0, %v3641_v47  ;;  %v547_v18 = vmul.f32 0.5, %v531_v11  ;;  %v568_v19 = vmul.f32 %v552_v62, %v3936_v63  ;;  %v769_v3 = vld [vmem:[%s5062_s7 + $0x188] sm:$0xff]  ;;  %v760_v7 = vld [vmem:[%s5062_s7 + $0x140] sm:$0xff] }
 0x326   :  { %v585_v42 = vpack.c.bf16 %v577_v61, %v575_v28  ;;  %v582_v20 = vpack.c.bf16 %v572_v60, %v570_v17  ;;  %v548_v15 = vmul.f32 0.5, %v532_v56  ;;  %v772_v28 = vld [vmem:[%s5062_s7 + $0x1a0] sm:$0xff]  ;;  %v3119_v47 = vcombine.high %v769_v3, %v773_v5 }
 0x327   :  { %v566_v26 = vmul.f32 %v550_v16, %v3946_v6  ;;  %v546_v58 = vmul.f32 0.5, %v530_v45  ;;  %v563_v4 = vmul.f32 %v547_v18, %v3925_v54  ;;  %v593_v6 = vpop.permute.xlu1 %592  ;;  %v3117_v1 = vcombine.high %v768_v57, %v772_v28  ;;  %v752_v56 = vld [vmem:[%s5062_s7 + $0x100] sm:$0xff] }
 0x328   :  { %617 = vmatprep.subr.bf16.mxu1 %v585_v42  ;;  %v564_v27 = vmul.f32 %v548_v15, %v3927_v55  ;;  %v764_v42 = vld [vmem:[%s5062_s7 + $0x160] sm:$0xff]  ;;  %v3116_v11 = vcombine.low %v768_v57, %v772_v28  ;;  %v3118_v62 = vcombine.low %v769_v3, %v773_v5  ;;  %v3110_v17 = vcombine.low %v761_v9, %v765_v10  ;;  %v749_v15 = vld [vmem:[%s5062_s7 + $0xe8] sm:$0xff] }
 0x329   :  { %618 = vmatpush1.bf16.msra.mxu1 %v584_v13  ;;  %v580_v37 = vpack.c.bf16 %v568_v19, %v566_v26  ;;  %v579_v31 = vpack.c.bf16 %v565_v25, %v563_v4  ;;  %v562_v52 = vmul.f32 %v546_v58, %v3933_v59  ;;  %v3109_v60 = vcombine.high %v760_v7, %v764_v42  ;;  %v744_v18 = vld [vmem:[%s5062_s7 + $0xc0] sm:$0xff]  ;;  %v841_v28 = vld [vmem:[%s5062_s7 + $0x3c8] sm:$0xff] }
 0x32a   :  { %619 = vmatprep.subr.bf16.mxu1 %v583_v12  ;;  %v3111_v13 = vcombine.high %v761_v9, %v765_v10  ;;  %v756_v12 = vld [vmem:[%s5062_s7 + $0x120] sm:$0xff]  ;;  %v3108_v16 = vcombine.low %v760_v7, %v764_v42  ;;  %v3102_v25 = vcombine.low %v753_v32, %v757_v14 }
 0x32b   :  { %v578_v63 = vpack.c.bf16 %v564_v27, %v562_v52  ;;  %v3101_v45 = vcombine.high %v752_v56, %v756_v12  ;;  %v748_v19 = vld [vmem:[%s5062_s7 + $0xe0] sm:$0xff]  ;;  %v737_v27 = vld [vmem:[%s5062_s7 + $0x88] sm:$0xff] }
 0x32c   :  { %v3093_v26 = vcombine.high %v744_v18, %v748_v19  ;;  %v736_v4 = vld [vmem:[%s5062_s7 + $0x80] sm:$0xff]  ;;  %v3092_v52 = vcombine.low %v744_v18, %v748_v19  ;;  %v833_v19 = vld [vmem:[%s5062_s7 + $0x388] sm:$0xff] }
 0x32d   :  { %620 = vmatpush1.bf16.msra.mxu1 %v582_v20  ;;  %v745_v20 = vld [vmem:[%s5062_s7 + $0xc8] sm:$0xff]  ;;  %v844_v57 = vld [vmem:[%s5062_s7 + $0x3e0] sm:$0xff] }
 0x32e   :  { %621 = vmatprep.subr.bf16.mxu1 %v581_v24  ;;  %v3100_v24 = vcombine.low %v752_v56, %v756_v12  ;;  %v3095_v58 = vcombine.high %v745_v20, %v749_v15  ;;  %v836_v18 = vld [vmem:[%s5062_s7 + $0x3a0] sm:$0xff] }
 0x331   :  { %622 = vmatpush1.bf16.msra.mxu1 %v580_v37  ;;  %v740_v37 = vld [vmem:[%s5062_s7 + $0xa0] sm:$0xff] }
 0x332   :  { %623 = vmatprep.subr.bf16.mxu1 %v579_v31  ;;  %v741_v31 = vld [vmem:[%s5062_s7 + $0xa8] sm:$0xff] }
 0x335   :  { %624 = vmatpush1.bf16.msra.mxu1 %v578_v63  ;;  %v3094_v63 = vcombine.low %v745_v20, %v749_v15 }
 0x338   :  { %3067 = vmatmul.mubr.msk.bf16.vlgmr.msra.gmra.mxu1 %vm605_vm1, %v3397_v48  ;;  %v3085_v48 = vcombine.high %v736_v4, %v740_v37 }
 0x3f8   :  { %v643_v33 = vpop.f32.mrf.mxu1 }
 0x3f9   :  { %v644_v36 = vadd.f32 %v643_v33, %v593_v6  ;;  %v728_v33 = vld [vmem:[%s5062_s7 + $0x40] sm:$0xff] }
 0x3fa   :  { %v645_v54 = vpop.f32.mrf.mxu1 }
 0x3fb   :  { %v646_v38 = vadd.f32 %v645_v54, %v593_v6  ;;  %v4036_v41 = vadd.f32 %v644_v36, %v3844_v29  ;;  %v3087_v6 = vcombine.high %v737_v27, %v741_v31  ;;  %v732_v36 = vld [vmem:[%s5062_s7 + $0x60] sm:$0xff]  ;;  %v729_v54 = vld [vmem:[%s5062_s7 + $0x48] sm:$0xff] }
 0x3fc   :  { %v647_v55 = vpop.f32.mrf.mxu1 }
 0x3fd   :  { %v4039_v59 = vadd.f32 %v646_v38, %v3846_v30  ;;  %v648_v43 = vadd.f32 %v647_v55, %v598_v40  ;;  %v776_v30 = vld [vmem:[%s5062_s7 + $0x1c0] sm:$0xff]  ;;  %v733_v38 = vld [vmem:[%s5062_s7 + $0x68] sm:$0xff]  ;;  %v3086_v55 = vcombine.low %v737_v27, %v741_v31 }
 0x3fe   :  { %v649_v44 = vpop.f32.mrf.mxu1  ;;  %v3124_v2 = vcombine.low %v776_v30, %v780_v51 }
 0x3ff   :  { %v650_v46 = vadd.f32 %v649_v44, %v598_v40  ;;  %v656_v39 = vadd.f32 %v4039_v59, %v4036_v41  ;;  %v4044_v49 = vadd.f32 %v648_v43, %v3850_v34  ;;  %v777_v34 = vld [vmem:[%s5062_s7 + $0x1c8] sm:$0xff]  ;;  %v3084_v40 = vcombine.low %v736_v4, %v740_v37  ;;  %v828_v4 = vld [vmem:[%s5062_s7 + $0x360] sm:$0xff] }
 0x400   :  { %v3126_v61 = vcombine.low %v777_v34, %v781_v53  ;;  %v3127_v0 = vcombine.high %v777_v34, %v781_v53  ;;  %v3077_v43 = vcombine.high %v728_v33, %v732_v36  ;;  %v3079_v44 = vcombine.high %v729_v54, %v733_v38  ;;  %v840_v53 = vld [vmem:[%s5062_s7 + $0x3c0] sm:$0xff]  ;;  %v825_v37 = vld [vmem:[%s5062_s7 + $0x348] sm:$0xff] }
 0x401   :  { %v4047_v50 = vadd.f32 %v650_v46, %v3852_v35  ;;  %657 = vadd.xlane.f32.xlu1 %v656_v39  ;;  %v3125_v35 = vcombine.high %v776_v30, %v780_v51  ;;  %v720_v46 = vld [vmem:[%s5062_s7] sm:$0xff]  ;;  %v725_v30 = vld [vmem:[%s5062_s7 + $0x28] sm:$0xff]  ;;  %v3076_v51 = vcombine.low %v728_v33, %v732_v36  ;;  %v3078_v34 = vcombine.low %v729_v54, %v733_v38 }
 0x402   :  { %1573 = vmatprep.subr.bf16.mxu1 %v3127_v0  ;;  %v724_v39 = vld [vmem:[%s5062_s7 + $0x20] sm:$0xff]  ;;  %v3189_v3 = vcombine.high %v840_v53, %v844_v57  ;;  %v3188_v7 = vcombine.low %v840_v53, %v844_v57  ;;  %v817_v54 = vld [vmem:[%s5062_s7 + $0x308] sm:$0xff] }
 0x403   :  { %v659_v29 = vadd.f32 %v4047_v50, %v4044_v49  ;;  %1530 = vmatprep.subr.bf16.mxu0 %v3125_v35  ;;  %1574 = vmatpush1.bf16.msra.mxu1 %v3126_v61  ;;  %v845_v61 = vld [vmem:[%s5062_s7 + $0x3e8] sm:$0xff]  ;;  %v3068_v0 = vcombine.low %v720_v46, %v724_v39 }
 0x404   :  { %1531 = vmatpush1.bf16.msra.mxu0 %v3124_v2  ;;  %1575 = vmatprep.subr.bf16.mxu1 %v3119_v47  ;;  %v3069_v2 = vcombine.high %v720_v46, %v724_v39  ;;  %v3191_v5 = vcombine.high %v841_v28, %v845_v61  ;;  %v3190_v47 = vcombine.low %v841_v28, %v845_v61  ;;  %v821_v38 = vld [vmem:[%s5062_s7 + $0x328] sm:$0xff] }
 0x405   :  { %660 = vadd.xlane.f32.xlu0 %v659_v29  ;;  %1532 = vmatprep.subr.bf16.mxu0 %v3117_v1  ;;  %v721_v29 = vld [vmem:[%s5062_s7 + $0x8] sm:$0xff] }
 0x406   :  { %v3071_v35 = vcombine.high %v721_v29, %v725_v30  ;;  %v3070_v1 = vcombine.low %v721_v29, %v725_v30  ;;  %v813_v46 = vld [vmem:[%s5062_s7 + $0x2e8] sm:$0xff]  ;;  %v3166_v29 = vcombine.low %v817_v54, %v821_v38 }
 0x407   :  { %1576 = vmatpush1.bf16.msra.mxu1 %v3118_v62  ;;  %v805_v53 = vld [vmem:[%s5062_s7 + $0x2a8] sm:$0xff] }
 0x408   :  { %1533 = vmatpush1.bf16.msra.mxu0 %v3116_v11  ;;  %1577 = vmatprep.subr.bf16.mxu1 %v3111_v13 }
 0x409   :  { %1534 = vmatprep.subr.bf16.mxu0 %v3109_v60 }
 0x40b   :  { %1578 = vmatpush1.bf16.msra.mxu1 %v3110_v17 }
 0x40c   :  { %1535 = vmatpush1.bf16.msra.mxu0 %v3108_v16  ;;  %1579 = vmatprep.subr.bf16.mxu1 %v3103_v8  ;;  %v832_v8 = vld [vmem:[%s5062_s7 + $0x380] sm:$0xff] }
 0x40d   :  { %1536 = vmatprep.subr.bf16.mxu0 %v3101_v45  ;;  %v3180_v20 = vcombine.low %v832_v8, %v836_v18  ;;  %v3181_v15 = vcombine.high %v832_v8, %v836_v18 }
 0x40f   :  { %1580 = vmatpush1.bf16.msra.mxu1 %v3102_v25 }
 0x410   :  { %1537 = vmatpush1.bf16.msra.mxu0 %v3100_v24  ;;  %1581 = vmatprep.subr.bf16.mxu1 %v3095_v58  ;;  %v837_v24 = vld [vmem:[%s5062_s7 + $0x3a8] sm:$0xff]  ;;  %v824_v58 = vld [vmem:[%s5062_s7 + $0x340] sm:$0xff] }
 0x411   :  { %1538 = vmatprep.subr.bf16.mxu0 %v3093_v26  ;;  %v3182_v25 = vcombine.low %v833_v19, %v837_v24  ;;  %v3183_v26 = vcombine.high %v833_v19, %v837_v24  ;;  %v3172_v27 = vcombine.low %v824_v58, %v828_v4  ;;  %v3173_v31 = vcombine.high %v824_v58, %v828_v4  ;;  %v779_v24 = vld [vmem:[%s5062_s7 + $0x1d8] sm:$0xff] }
 0x412   :  { %v783_v58 = vld [vmem:[%s5062_s7 + $0x1f8] sm:$0xff] }
 0x413   :  { %1582 = vmatpush1.bf16.msra.mxu1 %v3094_v63  ;;  %v816_v63 = vld [vmem:[%s5062_s7 + $0x300] sm:$0xff]  ;;  %v3130_v4 = vcombine.low %v779_v24, %v783_v58 }
 0x414   :  { %1539 = vmatpush1.bf16.msra.mxu0 %v3092_v52  ;;  %1583 = vmatprep.subr.bf16.mxu1 %v3087_v6  ;;  %v829_v52 = vld [vmem:[%s5062_s7 + $0x368] sm:$0xff] }
 0x415   :  { %1540 = vmatprep.subr.bf16.mxu0 %v3085_v48  ;;  %v820_v48 = vld [vmem:[%s5062_s7 + $0x320] sm:$0xff]  ;;  %v3174_v6 = vcombine.low %v825_v37, %v829_v52  ;;  %v3175_v33 = vcombine.high %v825_v37, %v829_v52  ;;  %v3131_v37 = vcombine.high %v779_v24, %v783_v58  ;;  %v750_v24 = vld [vmem:[%s5062_s7 + $0xf0] sm:$0xff] }
 0x416   :  { %v3165_v36 = vcombine.high %v816_v63, %v820_v48  ;;  %v3164_v39 = vcombine.low %v816_v63, %v820_v48 }
 0x417   :  { %1584 = vmatpush1.bf16.msra.mxu1 %v3086_v55  ;;  %v3167_v55 = vcombine.high %v817_v54, %v821_v38  ;;  %v3040_v54 = vld [vmem:[%s5057_s2 + $0x4] ss:$8 sm:$0x3] }
 0x418   :  { %1541 = vmatpush1.bf16.msra.mxu0 %v3084_v40  ;;  %1585 = vmatprep.subr.bf16.mxu1 %v3079_v44  ;;  %v808_v40 = vld [vmem:[%s5062_s7 + $0x2c0] sm:$0xff]  ;;  %v809_v44 = vld [vmem:[%s5062_s7 + $0x2c8] sm:$0xff] }
 0x419   :  { %1542 = vmatprep.subr.bf16.mxu0 %v3077_v43  ;;  %v812_v43 = vld [vmem:[%s5062_s7 + $0x2e0] sm:$0xff]  ;;  %v3158_v28 = vcombine.low %v809_v44, %v813_v46 }
 0x41a   :  { %v3157_v30 = vcombine.high %v808_v40, %v812_v43  ;;  %v3156_v57 = vcombine.low %v808_v40, %v812_v43 }
 0x41b   :  { %1586 = vmatpush1.bf16.msra.mxu1 %v3078_v34  ;;  %v800_v34 = vld [vmem:[%s5062_s7 + $0x280] sm:$0xff] }
 0x41c   :  { %1543 = vmatpush1.bf16.msra.mxu0 %v3076_v51  ;;  %1587 = vmatprep.subr.bf16.mxu1 %v3071_v35  ;;  %v3159_v51 = vcombine.high %v809_v44, %v813_v46  ;;  %v801_v35 = vld [vmem:[%s5062_s7 + $0x288] sm:$0xff]  ;;  %v711_v46 = vrot.slane %v3040_v54, %v3837_v23 }
 0x41d   :  { %1544 = vmatprep.subr.bf16.mxu0 %v3069_v2  ;;  %v804_v2 = vld [vmem:[%s5062_s7 + $0x2a0] sm:$0xff] }
 0x41e   :  { %v3149_v61 = vcombine.high %v800_v34, %v804_v2 }
 0x41f   :  { %1588 = vmatpush1.bf16.msra.mxu1 %v3070_v1  ;;  %v792_v1 = vld [vmem:[%s5062_s7 + $0x240] sm:$0xff] }
 0x420   :  { %1545 = vmatpush1.bf16.msra.mxu0 %v3068_v0  ;;  %1589 = vmatprep.subr.bf16.mxu1 %v3191_v5  ;;  %v3151_v0 = vcombine.high %v801_v35, %v805_v53  ;;  %v793_v5 = vld [vmem:[%s5062_s7 + $0x248] sm:$0xff] }
 0x421   :  { %1546 = vmatprep.subr.bf16.mxu0 %v3189_v3  ;;  %v796_v3 = vld [vmem:[%s5062_s7 + $0x260] sm:$0xff] }
 0x423   :  { %1590 = vmatpush2.bf16.msra.mxu1 %v3190_v47  ;;  %v3148_v47 = vcombine.low %v800_v34, %v804_v2 }
 0x424   :  { %1547 = vmatpush2.bf16.msra.mxu0 %v3188_v7  ;;  %1591 = vmatprep.subr.bf16.mxu1 %v3183_v26  ;;  %v797_v7 = vld [vmem:[%s5062_s7 + $0x268] sm:$0xff] }
 0x425   :  { %1548 = vmatprep.subr.bf16.mxu0 %v3181_v15  ;;  %v782_v15 = vld [vmem:[%s5062_s7 + $0x1f0] sm:$0xff] }
 0x427   :  { %1592 = vmatpush2.bf16.msra.mxu1 %v3182_v25 }
 0x428   :  { %1549 = vmatpush2.bf16.msra.mxu0 %v3180_v20  ;;  %1593 = vmatprep.subr.bf16.mxu1 %v3175_v33  ;;  %v778_v20 = vld [vmem:[%s5062_s7 + $0x1d0] sm:$0xff]  ;;  %v3039_v33 = vld [vmem:[%s5057_s2 + $0x3] ss:$8 sm:$0x3] }
 0x429   :  { %1550 = vmatprep.subr.bf16.mxu0 %v3173_v31  ;;  %v3128_v25 = vcombine.low %v778_v20, %v782_v15  ;;  %v3129_v26 = vcombine.high %v778_v20, %v782_v15  ;;  %v696_v40 = vrot.slane %v3039_v33, %v3837_v23  ;;  %v692_v43 = vrot.slane %v3039_v33, %v3834_v22  ;;  %v746_v15 = vld [vmem:[%s5062_s7 + $0xd0] sm:$0xff] }
 0x42b   :  { %1594 = vmatpush2.bf16.msra.mxu1 %v3174_v6 }
 0x42c   :  { %1551 = vmatpush2.bf16.msra.mxu0 %v3172_v27  ;;  %1595 = vmatprep.subr.bf16.mxu1 %v3167_v55 }
 0x42d   :  { %1552 = vmatprep.subr.bf16.mxu0 %v3165_v36 }
 0x42f   :  { %1596 = vmatpush2.bf16.msra.mxu1 %v3166_v29 }
 0x430   :  { %1553 = vmatpush2.bf16.msra.mxu0 %v3164_v39  ;;  %1597 = vmatprep.subr.bf16.mxu1 %v3159_v51  ;;  %v707_v39 = vrot.slane %v3040_v54, %v3834_v22 }
 0x431   :  { %1554 = vmatprep.subr.bf16.mxu0 %v3157_v30 }
 0x433   :  { %1598 = vmatpush2.bf16.msra.mxu1 %v3158_v28 }
 0x434   :  { %1555 = vmatpush2.bf16.msra.mxu0 %v3156_v57  ;;  %1599 = vmatprep.subr.bf16.mxu1 %v3151_v0 }
 0x435   :  { %1556 = vmatprep.subr.bf16.mxu0 %v3149_v61  ;;  %v774_v61 = vld [vmem:[%s5062_s7 + $0x1b0] sm:$0xff] }
 0x438   :  { %1557 = vmatpush2.bf16.msra.mxu0 %v3148_v47  ;;  %v766_v47 = vld [vmem:[%s5062_s7 + $0x170] sm:$0xff] }
 0x48a   :  { %v658_v42 = vpop.xlane.xlu1 %657 }
 0x48b   :  { %v662_v9 = vmul.f32 0.00390625, %v658_v42  ;;  %v3150_v42 = vcombine.low %v801_v35, %v805_v53 }
 0x48d   :  { %v4160_v10 = vsub.f32 %v4036_v41, %v662_v9  ;;  %v4163_v11 = vsub.f32 %v4039_v59, %v662_v9  ;;  %v3141_v9 = vcombine.high %v792_v1, %v796_v3  ;;  %1600 = vmatpush2.bf16.msra.mxu1 %v3150_v42  ;;  %v763_v42 = vld [vmem:[%s5062_s7 + $0x158] sm:$0xff] }
 0x48e   :  { %v661_v62 = vpop.xlane.xlu0 %660 }
 0x48f   :  { %v663_v60 = vmul.f32 0.00390625, %v661_v62  ;;  %v668_v13 = vmul.f32 %v4160_v10, %v4160_v10  ;;  %v669_v56 = vmul.f32 %v4163_v11, %v4163_v11  ;;  %v3143_v62 = vcombine.high %v793_v5, %v797_v7  ;;  %1558 = vmatprep.subr.bf16.mxu0 %v3141_v9  ;;  %v767_v9 = vld [vmem:[%s5062_s7 + $0x178] sm:$0xff] }
 0x491   :  { %v4170_v12 = vsub.f32 %v4044_v49, %v663_v60  ;;  %v4173_v32 = vsub.f32 %v4047_v50, %v663_v60  ;;  %v672_v14 = vadd.f32 %v669_v56, %v668_v13  ;;  %v784_v60 = vld [vmem:[%s5062_s7 + $0x200] sm:$0xff]  ;;  %v785_v56 = vld [vmem:[%s5062_s7 + $0x208] sm:$0xff]  ;;  %1601 = vmatprep.subr.bf16.mxu1 %v3143_v62 }
 0x492   :  { %v788_v13 = vld [vmem:[%s5062_s7 + $0x220] sm:$0xff] }
 0x493   :  { %673 = vadd.xlane.f32.xlu0 %v672_v14  ;;  %v670_v16 = vmul.f32 %v4170_v12, %v4170_v12  ;;  %v671_v17 = vmul.f32 %v4173_v32, %v4173_v32  ;;  %v789_v14 = vld [vmem:[%s5062_s7 + $0x228] sm:$0xff]  ;;  %v3132_v18 = vcombine.low %v784_v60, %v788_v13 }
 0x494   :  { %v3135_v8 = vcombine.high %v785_v56, %v789_v14  ;;  %v3134_v19 = vcombine.low %v785_v56, %v789_v14  ;;  %v3115_v56 = vcombine.high %v763_v42, %v767_v9  ;;  %v754_v14 = vld [vmem:[%s5062_s7 + $0x110] sm:$0xff] }
 0x495   :  { %v675_v45 = vadd.f32 %v671_v17, %v670_v16  ;;  %v3140_v16 = vcombine.low %v792_v1, %v796_v3  ;;  %v3142_v17 = vcombine.low %v793_v5, %v797_v7  ;;  %v762_v3 = vld [vmem:[%s5062_s7 + $0x150] sm:$0xff] }
 0x497   :  { %676 = vadd.xlane.f32.xlu1 %v675_v45  ;;  %v3133_v45 = vcombine.high %v784_v60, %v788_v13  ;;  %1559 = vmatpush2.bf16.msra.mxu0 %v3140_v16  ;;  %v3113_v13 = vcombine.high %v762_v3, %v766_v47  ;;  %v758_v16 = vld [vmem:[%s5062_s7 + $0x130] sm:$0xff] }
 0x498   :  { %1602 = vmatpush2.bf16.msra.mxu1 %v3142_v17  ;;  %v755_v17 = vld [vmem:[%s5062_s7 + $0x118] sm:$0xff]  ;;  %v3104_v58 = vcombine.low %v754_v14, %v758_v16 }
 0x499   :  { %1560 = vmatprep.subr.bf16.mxu0 %v3133_v45  ;;  %1603 = vmatprep.subr.bf16.mxu1 %v3135_v8  ;;  %v759_v45 = vld [vmem:[%s5062_s7 + $0x138] sm:$0xff]  ;;  %v3112_v8 = vcombine.low %v762_v3, %v766_v47  ;;  %v838_v47 = vld [vmem:[%s5062_s7 + $0x3b0] sm:$0xff] }
 0x49a   :  { %v3107_v20 = vcombine.high %v755_v17, %v759_v45 }
 0x49b   :  { %1561 = vmatpush2.bf16.msra.mxu0 %v3132_v18  ;;  %v3114_v18 = vcombine.low %v763_v42, %v767_v9  ;;  %v835_v42 = vld [vmem:[%s5062_s7 + $0x398] sm:$0xff] }
 0x49c   :  { %1604 = vmatpush2.bf16.msra.mxu1 %v3134_v19  ;;  %1616 = vmatprep.subr.bf16.mxu0 %v3129_v26  ;;  %v3105_v19 = vcombine.high %v754_v14, %v758_v16  ;;  %v751_v26 = vld [vmem:[%s5062_s7 + $0xf8] sm:$0xff]  ;;  %v826_v14 = vld [vmem:[%s5062_s7 + $0x350] sm:$0xff] }
 0x49d   :  { %1659 = vmatprep.subr.bf16.mxu1 %v3131_v37  ;;  %v3097_v37 = vcombine.high %v746_v15, %v750_v24  ;;  %v839_v9 = vld [vmem:[%s5062_s7 + $0x3b8] sm:$0xff]  ;;  %v830_v16 = vld [vmem:[%s5062_s7 + $0x370] sm:$0xff] }
 0x51c   :  { %v674_v27 = vpop.xlane.xlu0 %673 }
 0x51d   :  { %v678_v31 = vmul.f32 0.00390625, %v674_v27 }
 0x51f   :  { %v680_v52 = vadd.f32 1e-05, %v678_v31  ;;  %v738_v31 = vld [vmem:[%s5062_s7 + $0x90] sm:$0xff] }
 0x520   :  { %v677_v63 = vpop.xlane.xlu1 %676 }
 0x521   :  { %3642 = vrsqrt.f32 %v680_v52  ;;  %v679_v48 = vmul.f32 0.00390625, %v677_v63  ;;  %v742_v52 = vld [vmem:[%s5062_s7 + $0xb0] sm:$0xff]  ;;  %v739_v63 = vld [vmem:[%s5062_s7 + $0x98] sm:$0xff] }
 0x523   :  { %v681_v6 = vadd.f32 1e-05, %v679_v48  ;;  %v743_v48 = vld [vmem:[%s5062_s7 + $0xb8] sm:$0xff] }
 0x524   :  { %v3091_v54 = vcombine.high %v739_v63, %v743_v48 }
 0x525   :  { %3644 = vrsqrt.f32 %v681_v6  ;;  %v3096_v6 = vcombine.low %v746_v15, %v750_v24  ;;  %v818_v15 = vld [vmem:[%s5062_s7 + $0x310] sm:$0xff] }
 0x526   :  { %v822_v24 = vld [vmem:[%s5062_s7 + $0x330] sm:$0xff] }
 0x52e   :  { %v3643_v36 = vpop.eup %3642 }
 0x52f   :  { %v685_v38 = vmul.f32 %v3643_v36, %v4163_v11  ;;  %v684_v55 = vmul.f32 %v3643_v36, %v4160_v10  ;;  %v770_v10 = vld [vmem:[%s5062_s7 + $0x190] sm:$0xff]  ;;  %v3089_v36 = vcombine.high %v738_v31, %v742_v52 }
 0x530   :  { %v3121_v5 = vcombine.high %v770_v10, %v774_v61  ;;  %v3120_v62 = vcombine.low %v770_v10, %v774_v61  ;;  %v846_v10 = vld [vmem:[%s5062_s7 + $0x3f0] sm:$0xff]  ;;  %v843_v61 = vld [vmem:[%s5062_s7 + $0x3d8] sm:$0xff] }
 0x531   :  { %v700_v30 = vmul.f32 %v696_v40, %v685_v38  ;;  %v699_v34 = vmul.f32 %v692_v43, %v684_v55  ;;  %v730_v38 = vld [vmem:[%s5062_s7 + $0x50] sm:$0xff]  ;;  %v731_v55 = vld [vmem:[%s5062_s7 + $0x58] sm:$0xff] }
 0x532   :  { %v3645_v44 = vpop.eup %3644 }
 0x533   :  { %v687_v29 = vmul.f32 %v3645_v44, %v4173_v32  ;;  %v686_v51 = vmul.f32 %v3645_v44, %v4170_v12  ;;  %v715_v11 = vadd.f32 %v711_v46, %v700_v30  ;;  %v714_v57 = vadd.f32 %v707_v39, %v699_v34  ;;  %v771_v32 = vld [vmem:[%s5062_s7 + $0x198] sm:$0xff]  ;;  %v722_v30 = vld [vmem:[%s5062_s7 + $0x10] sm:$0xff] }
 0x534   :  { %v775_v12 = vld [vmem:[%s5062_s7 + $0x1b8] sm:$0xff]  ;;  %v3088_v44 = vcombine.low %v738_v31, %v742_v52  ;;  %v810_v31 = vld [vmem:[%s5062_s7 + $0x2d0] sm:$0xff] }
 0x535   :  { %v702_v2 = vmul.f32 %v696_v40, %v687_v29  ;;  %v701_v35 = vmul.f32 %v692_v43, %v686_v51  ;;  %v3123_v7 = vcombine.high %v771_v32, %v775_v12  ;;  %v3122_v60 = vcombine.low %v771_v32, %v775_v12  ;;  %v734_v40 = vld [vmem:[%s5062_s7 + $0x70] sm:$0xff]  ;;  %v735_v43 = vld [vmem:[%s5062_s7 + $0x78] sm:$0xff] }
 0x536   :  { %v3083_v29 = vcombine.high %v731_v55, %v735_v43  ;;  %v726_v51 = vld [vmem:[%s5062_s7 + $0x30] sm:$0xff]  ;;  %v723_v34 = vld [vmem:[%s5062_s7 + $0x18] sm:$0xff] }
 0x537   :  { %v717_v53 = vadd.f32 %v711_v46, %v702_v2  ;;  %v716_v28 = vadd.f32 %v707_v39, %v701_v35  ;;  %v3090_v46 = vcombine.low %v739_v63, %v743_v48  ;;  %v3081_v39 = vcombine.high %v730_v38, %v734_v40  ;;  %v727_v2 = vld [vmem:[%s5062_s7 + $0x38] sm:$0xff]  ;;  %v814_v52 = vld [vmem:[%s5062_s7 + $0x2f0] sm:$0xff] }
 0x538   :  { %v3080_v35 = vcombine.low %v730_v38, %v734_v40  ;;  %v847_v32 = vld [vmem:[%s5062_s7 + $0x3f8] sm:$0xff]  ;;  %v3072_v12 = vcombine.low %v722_v30, %v726_v51  ;;  %v802_v38 = vld [vmem:[%s5062_s7 + $0x290] sm:$0xff] }
 0x539   :  { %v719_v0 = vpack.c.bf16 %v717_v53, %v715_v11  ;;  %v4301_v1 = vpack.c.bf16 %v716_v28, %v714_v57  ;;  %v3082_v11 = vcombine.low %v731_v55, %v735_v43  ;;  %v3073_v53 = vcombine.high %v722_v30, %v726_v51  ;;  %v842_v28 = vld [vmem:[%s5062_s7 + $0x3d0] sm:$0xff]  ;;  %v811_v63 = vld [vmem:[%s5062_s7 + $0x2d8] sm:$0xff] }
 0x53a   :  { %v3075_v57 = vcombine.high %v723_v34, %v727_v2  ;;  %v3193_v3 = vcombine.high %v842_v28, %v846_v10  ;;  %v815_v48 = vld [vmem:[%s5062_s7 + $0x2f8] sm:$0xff]  ;;  %v806_v40 = vld [vmem:[%s5062_s7 + $0x2b0] sm:$0xff] }
 0x53b   :  { %1562 = vmatprep.mubr.bf16.mxu0 %v719_v0  ;;  %1605 = vmatprep.mubr.bf16.mxu1 %v719_v0  ;;  %v803_v55 = vld [vmem:[%s5062_s7 + $0x298] sm:$0xff]  ;;  %v794_v30 = vld [vmem:[%s5062_s7 + $0x250] sm:$0xff] }
 0x53c   :  { %1563 = vmatmul.mubr.bf16.vlgmr.msra.gmra.mxu0 %v4301_v1  ;;  %1606 = vmatmul.mubr.bf16.vlgmr.msra.gmra.mxu1 %v4301_v1  ;;  %v807_v43 = vld [vmem:[%s5062_s7 + $0x2b8] sm:$0xff]  ;;  %v798_v51 = vld [vmem:[%s5062_s7 + $0x270] sm:$0xff] }
 0x53d   :  { %1617 = vmatpush1.bf16.msra.mxu0 %v3128_v25  ;;  %1660 = vmatpush1.bf16.msra.mxu1 %v3130_v4  ;;  %v747_v25 = vld [vmem:[%s5062_s7 + $0xd8] sm:$0xff]  ;;  %v3106_v4 = vcombine.low %v755_v17, %v759_v45 }
 0x53e   :  { %1648 = vmatprep.mubr.bf16.mxu0 %v719_v0  ;;  %1691 = vmatprep.mubr.bf16.mxu1 %v719_v0  ;;  %v3099_v27 = vcombine.high %v747_v25, %v751_v26  ;;  %v3098_v33 = vcombine.low %v747_v25, %v751_v26  ;;  %v3074_v0 = vcombine.low %v723_v34, %v727_v2  ;;  %v827_v17 = vld [vmem:[%s5062_s7 + $0x358] sm:$0xff] }
 0x53f   :  { %1618 = vmatprep.subr.bf16.mxu0 %v3121_v5  ;;  %1661 = vmatprep.subr.bf16.mxu1 %v3123_v7  ;;  %v3195_v5 = vcombine.high %v843_v61, %v847_v32  ;;  %v834_v7 = vld [vmem:[%s5062_s7 + $0x390] sm:$0xff]  ;;  %v831_v45 = vld [vmem:[%s5062_s7 + $0x378] sm:$0xff] }
 0x540   :  { %v819_v25 = vld [vmem:[%s5062_s7 + $0x318] sm:$0xff] }
 0x541   :  { %1619 = vmatpush1.bf16.msra.mxu0 %v3120_v62  ;;  %1662 = vmatpush1.bf16.msra.mxu1 %v3122_v60  ;;  %v3192_v62 = vcombine.low %v842_v28, %v846_v10  ;;  %v3194_v60 = vcombine.low %v843_v61, %v847_v32  ;;  %v823_v26 = vld [vmem:[%s5062_s7 + $0x338] sm:$0xff]  ;;  %v786_v28 = vld [vmem:[%s5062_s7 + $0x210] sm:$0xff] }
 0x542   :  { %1620 = vmatprep.subr.bf16.mxu0 %v3113_v13  ;;  %1663 = vmatprep.subr.bf16.mxu1 %v3115_v56  ;;  %v3185_v13 = vcombine.high %v834_v7, %v838_v47  ;;  %v3187_v56 = vcombine.high %v835_v42, %v839_v9  ;;  %v795_v34 = vld [vmem:[%s5062_s7 + $0x258] sm:$0xff]  ;;  %v790_v10 = vld [vmem:[%s5062_s7 + $0x230] sm:$0xff] }
 0x543   :  { %v799_v2 = vld [vmem:[%s5062_s7 + $0x278] sm:$0xff] }
 0x544   :  { %v787_v61 = vld [vmem:[%s5062_s7 + $0x218] sm:$0xff] }
 0x545   :  { %1621 = vmatpush1.bf16.msra.mxu0 %v3112_v8  ;;  %1664 = vmatpush1.bf16.msra.mxu1 %v3114_v18  ;;  %v3184_v8 = vcombine.low %v834_v7, %v838_v47  ;;  %v3186_v18 = vcombine.low %v835_v42, %v839_v9  ;;  %v791_v32 = vld [vmem:[%s5062_s7 + $0x238] sm:$0xff]  ;;  %v3136_v7 = vcombine.low %v786_v28, %v790_v10 }
 0x546   :  { %1622 = vmatprep.subr.bf16.mxu0 %v3105_v19  ;;  %1665 = vmatprep.subr.bf16.mxu1 %v3107_v20  ;;  %v3177_v19 = vcombine.high %v826_v14, %v830_v16  ;;  %v3179_v20 = vcombine.high %v827_v17, %v831_v45  ;;  %v3138_v47 = vcombine.low %v787_v61, %v791_v32  ;;  %v3400_v42 = vld [vmem:[%s5064_s9 + $0x74] ss:$8 sps:$4 sm:$0xff]  }
 0x547   :  { %v3403_v9 = vld [vmem:[%s5064_s9 + $0x174] ss:$8 sps:$4 sm:$0xff]  }
 0x549   :  { %1623 = vmatpush1.bf16.msra.mxu0 %v3104_v58  ;;  %1666 = vmatpush1.bf16.msra.mxu1 %v3106_v4  ;;  %v3176_v58 = vcombine.low %v826_v14, %v830_v16  ;;  %v3178_v4 = vcombine.low %v827_v17, %v831_v45  ;;  %v3404_v14 = vld [vmem:[%s5064_s9 + $0x60] ss:$8 sps:$4 sm:$0xff]   ;;  %v3412_v17 = vld [vmem:[%s5064_s9 + $0x54] ss:$8 sps:$4 sm:$0xff]   ;;  %v3410_v45 = vld [vmem:[%s5064_s9 + $0x50] ss:$8 sps:$4 sm:$0xff]  }
 0x54a   :  { %1624 = vmatprep.subr.bf16.mxu0 %v3097_v37  ;;  %1667 = vmatprep.subr.bf16.mxu1 %v3099_v27  ;;  %v3169_v37 = vcombine.high %v818_v15, %v822_v24  ;;  %v3171_v27 = vcombine.high %v819_v25, %v823_v26  ;;  %v3407_v16 = vld [vmem:[%s5064_s9 + $0x160] ss:$8 sps:$4 sm:$0xff]  }
 0x54d   :  { %1625 = vmatpush1.bf16.msra.mxu0 %v3096_v6  ;;  %1668 = vmatpush1.bf16.msra.mxu1 %v3098_v33  ;;  %v3168_v6 = vcombine.low %v818_v15, %v822_v24  ;;  %v3170_v33 = vcombine.low %v819_v25, %v823_v26  ;;  %v3419_v15 = vld [vmem:[%s5064_s9 + $0x140] ss:$8 sps:$4 sm:$0xff]   ;;  %v3424_v24 = vld [vmem:[%s5064_s9 + $0x34] ss:$8 sps:$4 sm:$0xff]   ;;  %v3422_v26 = vld [vmem:[%s5064_s9 + $0x30] ss:$8 sps:$4 sm:$0xff]  }
 0x54e   :  { %1626 = vmatprep.subr.bf16.mxu0 %v3089_v36  ;;  %1669 = vmatprep.subr.bf16.mxu1 %v3091_v54  ;;  %v3161_v36 = vcombine.high %v810_v31, %v814_v52  ;;  %v3163_v54 = vcombine.high %v811_v63, %v815_v48  ;;  %v3427_v25 = vld [vmem:[%s5064_s9 + $0x134] ss:$8 sps:$4 sm:$0xff]  }
 0x551   :  { %1627 = vmatpush1.bf16.msra.mxu0 %v3088_v44  ;;  %1670 = vmatpush1.bf16.msra.mxu1 %v3090_v46  ;;  %v3160_v44 = vcombine.low %v810_v31, %v814_v52  ;;  %v3162_v46 = vcombine.low %v811_v63, %v815_v48  ;;  %v3431_v31 = vld [vmem:[%s5064_s9 + $0x120] ss:$8 sps:$4 sm:$0xff]   ;;  %v3436_v52 = vld [vmem:[%s5064_s9 + $0x14] ss:$8 sps:$4 sm:$0xff]   ;;  %v3434_v48 = vld [vmem:[%s5064_s9 + $0x10] ss:$8 sps:$4 sm:$0xff]  }
 0x552   :  { %1628 = vmatprep.subr.bf16.mxu0 %v3081_v39  ;;  %1671 = vmatprep.subr.bf16.mxu1 %v3083_v29  ;;  %v3153_v39 = vcombine.high %v802_v38, %v806_v40  ;;  %v3155_v29 = vcombine.high %v803_v55, %v807_v43  ;;  %v3439_v63 = vld [vmem:[%s5064_s9 + $0x114] ss:$8 sps:$4 sm:$0xff]  }
 0x555   :  { %1629 = vmatpush1.bf16.msra.mxu0 %v3080_v35  ;;  %1672 = vmatpush1.bf16.msra.mxu1 %v3082_v11  ;;  %v3152_v35 = vcombine.low %v802_v38, %v806_v40  ;;  %v3154_v11 = vcombine.low %v803_v55, %v807_v43  ;;  %v3443_v38 = vld [vmem:[%s5064_s9 + $0x100] ss:$8 sps:$4 sm:$0xff]   ;;  %v3448_v40 = vld [vmem:[%s5064_s9 + $0xf4] ss:$8 sps:$4 sm:$0xff]   ;;  %v3446_v43 = vld [vmem:[%s5064_s9 + $0xf0] ss:$8 sps:$4 sm:$0xff]  }
 0x556   :  { %1630 = vmatprep.subr.bf16.mxu0 %v3073_v53  ;;  %1673 = vmatprep.subr.bf16.mxu1 %v3075_v57  ;;  %v3145_v53 = vcombine.high %v794_v30, %v798_v51  ;;  %v3147_v57 = vcombine.high %v795_v34, %v799_v2  ;;  %v3451_v55 = vld [vmem:[%s5064_s9 + $0x1f4] ss:$8 sps:$4 sm:$0xff]  }
 0x559   :  { %1631 = vmatpush1.bf16.msra.mxu0 %v3072_v12  ;;  %1674 = vmatpush1.bf16.msra.mxu1 %v3074_v0  ;;  %v3144_v12 = vcombine.low %v794_v30, %v798_v51  ;;  %v3146_v0 = vcombine.low %v795_v34, %v799_v2  ;;  %v3455_v30 = vld [vmem:[%s5064_s9 + $0x1e0] ss:$8 sps:$4 sm:$0xff]   ;;  %v3460_v51 = vld [vmem:[%s5064_s9 + $0xd4] ss:$8 sps:$4 sm:$0xff]   ;;  %v3458_v2 = vld [vmem:[%s5064_s9 + $0xd0] ss:$8 sps:$4 sm:$0xff]  }
 0x55a   :  { %1632 = vmatprep.subr.bf16.mxu0 %v3193_v3  ;;  %1675 = vmatprep.subr.bf16.mxu1 %v3195_v5  ;;  %v3137_v3 = vcombine.high %v786_v28, %v790_v10  ;;  %v3139_v5 = vcombine.high %v787_v61, %v791_v32  ;;  %v3463_v34 = vld [vmem:[%s5064_s9 + $0x1d4] ss:$8 sps:$4 sm:$0xff]   ;;  %v3467_v28 = vld [vmem:[%s5064_s9 + $0x1c0] ss:$8 sps:$4 sm:$0xff]   ;;  %v3470_v32 = vld [vmem:[%s5064_s9 + $0xb0] ss:$8 sps:$4 sm:$0xff]  }
 0x55b   :  { %v3472_v10 = vld [vmem:[%s5064_s9 + $0xb4] ss:$8 sps:$4 sm:$0xff]  }
 0x55c   :  { %v3475_v61 = vld [vmem:[%s5064_s9 + $0x1b4] ss:$8 sps:$4 sm:$0xff]  }
 0x55d   :  { %1633 = vmatpush2.bf16.msra.mxu0 %v3192_v62  ;;  %1676 = vmatpush2.bf16.msra.mxu1 %v3194_v60  ;;  %v3398_v62 = vld [vmem:[%s5064_s9 + $0x70] ss:$8 sps:$4 sm:$0xff]  }
 0x55e   :  { %1634 = vmatprep.subr.bf16.mxu0 %v3185_v13  ;;  %1677 = vmatprep.subr.bf16.mxu1 %v3187_v56  ;;  %v3401_v60 = vld [vmem:[%s5064_s9 + $0x170] ss:$8 sps:$4 sm:$0xff]   ;;  %v3406_v13 = vld [vmem:[%s5064_s9 + $0x64] ss:$8 sps:$4 sm:$0xff]  }
 0x55f   :  { %v3409_v56 = vld [vmem:[%s5064_s9 + $0x164] ss:$8 sps:$4 sm:$0xff]  }
 0x561   :  { %1635 = vmatpush2.bf16.msra.mxu0 %v3184_v8  ;;  %1678 = vmatpush2.bf16.msra.mxu1 %v3186_v18  ;;  %v3413_v8 = vld [vmem:[%s5064_s9 + $0x150] ss:$8 sps:$4 sm:$0xff]   ;;  %v3418_v18 = vld [vmem:[%s5064_s9 + $0x44] ss:$8 sps:$4 sm:$0xff]  }
 0x562   :  { %1636 = vmatprep.subr.bf16.mxu0 %v3177_v19  ;;  %1679 = vmatprep.subr.bf16.mxu1 %v3179_v20  ;;  %v3421_v19 = vld [vmem:[%s5064_s9 + $0x144] ss:$8 sps:$4 sm:$0xff]   ;;  %v3416_v20 = vld [vmem:[%s5064_s9 + $0x40] ss:$8 sps:$4 sm:$0xff]  }
 0x565   :  { %1637 = vmatpush2.bf16.msra.mxu0 %v3176_v58  ;;  %1680 = vmatpush2.bf16.msra.mxu1 %v3178_v4  ;;  %v3425_v58 = vld [vmem:[%s5064_s9 + $0x130] ss:$8 sps:$4 sm:$0xff]   ;;  %v3430_v4 = vld [vmem:[%s5064_s9 + $0x24] ss:$8 sps:$4 sm:$0xff]  }
 0x566   :  { %1638 = vmatprep.subr.bf16.mxu0 %v3169_v37  ;;  %1681 = vmatprep.subr.bf16.mxu1 %v3171_v27  ;;  %v3433_v37 = vld [vmem:[%s5064_s9 + $0x124] ss:$8 sps:$4 sm:$0xff]   ;;  %v3428_v27 = vld [vmem:[%s5064_s9 + $0x20] ss:$8 sps:$4 sm:$0xff]  }
 0x569   :  { %1639 = vmatpush2.bf16.msra.mxu0 %v3168_v6  ;;  %1682 = vmatpush2.bf16.msra.mxu1 %v3170_v33  ;;  %v3437_v6 = vld [vmem:[%s5064_s9 + $0x110] ss:$8 sps:$4 sm:$0xff]   ;;  %v3442_v33 = vld [vmem:[%s5064_s9 + $0x4] ss:$8 sps:$4 sm:$0xff]  }
 0x56a   :  { %1640 = vmatprep.subr.bf16.mxu0 %v3161_v36  ;;  %1683 = vmatprep.subr.bf16.mxu1 %v3163_v54  ;;  %v3445_v36 = vld [vmem:[%s5064_s9 + $0x104] ss:$8 sps:$4 sm:$0xff]   ;;  %v3440_v54 = vld [vmem:[%s5064_s9] ss:$8 sps:$4 sm:$0xff]  }
 0x56d   :  { %1641 = vmatpush2.bf16.msra.mxu0 %v3160_v44  ;;  %1684 = vmatpush2.bf16.msra.mxu1 %v3162_v46  ;;  %v3449_v44 = vld [vmem:[%s5064_s9 + $0x1f0] ss:$8 sps:$4 sm:$0xff]   ;;  %v3454_v46 = vld [vmem:[%s5064_s9 + $0xe4] ss:$8 sps:$4 sm:$0xff]  }
 0x56e   :  { %1642 = vmatprep.subr.bf16.mxu0 %v3153_v39  ;;  %1685 = vmatprep.subr.bf16.mxu1 %v3155_v29  ;;  %v3457_v39 = vld [vmem:[%s5064_s9 + $0x1e4] ss:$8 sps:$4 sm:$0xff]   ;;  %v3452_v29 = vld [vmem:[%s5064_s9 + $0xe0] ss:$8 sps:$4 sm:$0xff]  }
 0x571   :  { %1643 = vmatpush2.bf16.msra.mxu0 %v3152_v35  ;;  %1686 = vmatpush2.bf16.msra.mxu1 %v3154_v11  ;;  %v3461_v35 = vld [vmem:[%s5064_s9 + $0x1d0] ss:$8 sps:$4 sm:$0xff]   ;;  %v3466_v11 = vld [vmem:[%s5064_s9 + $0xc4] ss:$8 sps:$4 sm:$0xff]  }
 0x572   :  { %1644 = vmatprep.subr.bf16.mxu0 %v3145_v53  ;;  %1687 = vmatprep.subr.bf16.mxu1 %v3147_v57  ;;  %v3469_v53 = vld [vmem:[%s5064_s9 + $0x1c4] ss:$8 sps:$4 sm:$0xff]   ;;  %v3464_v57 = vld [vmem:[%s5064_s9 + $0xc0] ss:$8 sps:$4 sm:$0xff]  }
 0x575   :  { %1645 = vmatpush2.bf16.msra.mxu0 %v3144_v12  ;;  %1688 = vmatpush2.bf16.msra.mxu1 %v3146_v0  ;;  %v3473_v12 = vld [vmem:[%s5064_s9 + $0x1b0] ss:$8 sps:$4 sm:$0xff]   ;;  %v3478_v0 = vld [vmem:[%s5064_s9 + $0xa4] ss:$8 sps:$4 sm:$0xff]  }
 0x576   :  { %1646 = vmatprep.subr.bf16.mxu0 %v3137_v3  ;;  %1689 = vmatprep.subr.bf16.mxu1 %v3139_v5  ;;  %v3481_v3 = vld [vmem:[%s5064_s9 + $0x1a4] ss:$8 sps:$4 sm:$0xff]   ;;  %v3476_v5 = vld [vmem:[%s5064_s9 + $0xa0] ss:$8 sps:$4 sm:$0xff]  }
 0x579   :  { %1647 = vmatpush2.bf16.msra.mxu0 %v3136_v7  ;;  %1690 = vmatpush2.bf16.msra.mxu1 %v3138_v47  ;;  %v3479_v7 = vld [vmem:[%s5064_s9 + $0x1a0] ss:$8 sps:$4 sm:$0xff]   ;;  %v3484_v47 = vld [vmem:[%s5064_s9 + $0x94] ss:$8 sps:$4 sm:$0xff]  }
 0x57a   :  { %2633 = vmatprep.subr.bf16.mxu0 %v3400_v42  ;;  %2676 = vmatprep.subr.bf16.mxu1 %v3403_v9  ;;  %v3487_v42 = vld [vmem:[%s5064_s9 + $0x194] ss:$8 sps:$4 sm:$0xff]   ;;  %v3482_v9 = vld [vmem:[%s5064_s9 + $0x90] ss:$8 sps:$4 sm:$0xff]  }
 0x57c   :  { %1649 = vmatmul.mubr.bf16.vlgmr.msra.gmra.mxu0 %v4301_v1  ;;  %1692 = vmatmul.mubr.bf16.vlgmr.msra.gmra.mxu1 %v4301_v1  ;;  %v3415_v1 = vld [vmem:[%s5064_s9 + $0x154] ss:$8 sps:$4 sm:$0xff]  }
 0x57d   :  { %2634 = vmatpush1.bf16.msra.mxu0 %v3398_v62  ;;  %2677 = vmatpush1.bf16.msra.mxu1 %v3401_v60  ;;  %v3485_v62 = vld [vmem:[%s5064_s9 + $0x190] ss:$8 sps:$4 sm:$0xff]   ;;  %v3490_v60 = vld [vmem:[%s5064_s9 + $0x84] ss:$8 sps:$4 sm:$0xff]  }
 0x57e   :  { %2635 = vmatprep.subr.bf16.mxu0 %v3406_v13  ;;  %2678 = vmatprep.subr.bf16.mxu1 %v3409_v56  ;;  %v3493_v13 = vld [vmem:[%s5064_s9 + $0x184] ss:$8 sps:$4 sm:$0xff]   ;;  %v3488_v56 = vld [vmem:[%s5064_s9 + $0x80] ss:$8 sps:$4 sm:$0xff]  }
 0x581   :  { %2636 = vmatpush1.bf16.msra.mxu0 %v3404_v14  ;;  %2679 = vmatpush1.bf16.msra.mxu1 %v3407_v16  ;;  %v3491_v14 = vld [vmem:[%s5064_s9 + $0x180] ss:$8 sps:$4 sm:$0xff]   ;;  %v3496_v16 = vld [vmem:[%s5064_s9 + $0x274] ss:$8 sps:$4 sm:$0xff]  }
 0x582   :  { %2637 = vmatprep.subr.bf16.mxu0 %v3412_v17  ;;  %2680 = vmatprep.subr.bf16.mxu1 %v3415_v1  ;;  %v3499_v17 = vld [vmem:[%s5064_s9 + $0x374] ss:$8 sps:$4 sm:$0xff]   ;;  %v860_v1 = vsub.s32 2, %v3831_v21 }
 0x585   :  { %2638 = vmatpush1.bf16.msra.mxu0 %v3410_v45  ;;  %2681 = vmatpush1.bf16.msra.mxu1 %v3413_v8  ;;  %v4677_v45 = vld [vmem:[%s5063_s8] sm:$0xff]  ;;  %v864_v8 = vsub.s32 3, %v3831_v21  ;;  %s3026_s8 = sshll.u32 %s3705_s16, 4  ;;  %s3027_s8 = int_to_ptr.vmem [resolvable:$true] %s3026_s8 }
 0x586   :  { %2639 = vmatprep.subr.bf16.mxu0 %v3418_v18  ;;  %2682 = vmatprep.subr.bf16.mxu1 %v3421_v19  ;;  %v853_v18 = vrot.slane %v4677_v45, %v3834_v22  ;;  %v861_v19 = vrot.slane %v4677_v45, %v860_v1  ;;  %s3682_s17 = scalar_lea.vmem %s3027_s8, 256  ;;  %p3687_p1 = scmp.lt.s32.totalorder %s3027_s8, %s3027_s8 }
 0x587   :  { %p3683_p0 = scmp.ne.s32.totalorder %s3027_s8, %s3682_s17  ;;  %p3688_p2 = scmp.lt.s32.totalorder %s3682_s17, %s3682_s17 }
 0x589   :  { %2640 = vmatpush1.bf16.msra.mxu0 %v3416_v20  ;;  %2683 = vmatpush1.bf16.msra.mxu1 %v3419_v15  ;;  %v857_v20 = vrot.slane %v4677_v45, %v3837_v23  ;;  %v865_v15 = vrot.slane %v4677_v45, %v864_v8  ;;  %p3689_p3 = por %p3688_p2, %p3687_p1 }
 0x58a   :  { %2641 = vmatprep.subr.bf16.mxu0 %v3424_v24  ;;  %2684 = vmatprep.subr.bf16.mxu1 %v3427_v25 }
 0x58b   :  { %p3690_p4 = pnand %p3689_p3, %p3683_p0 }
 0x58d   :  { %2642 = vmatpush1.bf16.msra.mxu0 %v3422_v26  ;;  %2685 = vmatpush1.bf16.msra.mxu1 %v3425_v58 }
 0x58e   :  { %2643 = vmatprep.subr.bf16.mxu0 %v3430_v4  ;;  %2686 = vmatprep.subr.bf16.mxu1 %v3433_v37 }
 0x591   :  { %2644 = vmatpush1.bf16.msra.mxu0 %v3428_v27  ;;  %2687 = vmatpush1.bf16.msra.mxu1 %v3431_v31 }
 0x592   :  { %2645 = vmatprep.subr.bf16.mxu0 %v3436_v52  ;;  %2688 = vmatprep.subr.bf16.mxu1 %v3439_v63 }
 0x595   :  { %2646 = vmatpush1.bf16.msra.mxu0 %v3434_v48  ;;  %2689 = vmatpush1.bf16.msra.mxu1 %v3437_v6 }
 0x596   :  { %2647 = vmatprep.subr.bf16.mxu0 %v3442_v33  ;;  %2690 = vmatprep.subr.bf16.mxu1 %v3445_v36 }
 0x599   :  { %2648 = vmatpush1.bf16.msra.mxu0 %v3440_v54  ;;  %2691 = vmatpush1.bf16.msra.mxu1 %v3443_v38 }
 0x59a   :  { %2649 = vmatprep.subr.bf16.mxu0 %v3448_v40  ;;  %2692 = vmatprep.subr.bf16.mxu1 %v3451_v55 }
 0x59d   :  { %2650 = vmatpush2.bf16.msra.mxu0 %v3446_v43  ;;  %2693 = vmatpush2.bf16.msra.mxu1 %v3449_v44 }
 0x59e   :  { %2651 = vmatprep.subr.bf16.mxu0 %v3454_v46  ;;  %2694 = vmatprep.subr.bf16.mxu1 %v3457_v39 }
 0x5a1   :  { %2652 = vmatpush2.bf16.msra.mxu0 %v3452_v29  ;;  %2695 = vmatpush2.bf16.msra.mxu1 %v3455_v30 }
 0x5a2   :  { %2653 = vmatprep.subr.bf16.mxu0 %v3460_v51  ;;  %2696 = vmatprep.subr.bf16.mxu1 %v3463_v34 }
 0x5a5   :  { %2654 = vmatpush2.bf16.msra.mxu0 %v3458_v2  ;;  %2697 = vmatpush2.bf16.msra.mxu1 %v3461_v35 }
 0x5a6   :  { %2655 = vmatprep.subr.bf16.mxu0 %v3466_v11  ;;  %2698 = vmatprep.subr.bf16.mxu1 %v3469_v53 }
 0x5a9   :  { %2656 = vmatpush2.bf16.msra.mxu0 %v3464_v57  ;;  %2699 = vmatpush2.bf16.msra.mxu1 %v3467_v28 }
 0x5aa   :  { %2657 = vmatprep.subr.bf16.mxu0 %v3472_v10  ;;  %2700 = vmatprep.subr.bf16.mxu1 %v3475_v61 }
 0x5ad   :  { %2658 = vmatpush2.bf16.msra.mxu0 %v3470_v32  ;;  %2701 = vmatpush2.bf16.msra.mxu1 %v3473_v12 }
 0x5ae   :  { %2659 = vmatprep.subr.bf16.mxu0 %v3478_v0  ;;  %2702 = vmatprep.subr.bf16.mxu1 %v3481_v3 }
 0x5b1   :  { %2660 = vmatpush2.bf16.msra.mxu0 %v3476_v5  ;;  %2703 = vmatpush2.bf16.msra.mxu1 %v3479_v7 }
 0x5b2   :  { %2661 = vmatprep.subr.bf16.mxu0 %v3484_v47  ;;  %2704 = vmatprep.subr.bf16.mxu1 %v3487_v42 }
 0x5b5   :  { %2662 = vmatpush2.bf16.msra.mxu0 %v3482_v9  ;;  %2705 = vmatpush2.bf16.msra.mxu1 %v3485_v62 }
 0x5b6   :  { %2663 = vmatprep.subr.bf16.mxu0 %v3490_v60  ;;  %2706 = vmatprep.subr.bf16.mxu1 %v3493_v13 }
 0x5b9   :  { %2664 = vmatpush2.bf16.msra.mxu0 %v3488_v56  ;;  %2707 = vmatpush2.bf16.msra.mxu1 %v3491_v14 }
 0x5ba   :  { %2719 = vmatprep.subr.bf16.mxu0 %v3496_v16  ;;  %2762 = vmatprep.subr.bf16.mxu1 %v3499_v17 }
 0x5fc   :  { %v1564_v24 = vpop.f32.mrf.mxu0  ;;  %v1607_v25 = vpop.f32.mrf.mxu1 }
 0x5fd   :  { %v4686_v26 = vadd.f32 %v1564_v24, %v853_v18  ;;  %v4688_v58 = vadd.f32 %v1607_v25, %v861_v19 }
 0x5fe   :  { %v1566_v4 = vpop.f32.mrf.mxu0  ;;  %v1609_v37 = vpop.f32.mrf.mxu1 }
 0x5ff   :  { %v1702_v27 = vmul.f32 %v4686_v26, %v4686_v26  ;;  %v1704_v31 = vmul.f32 %v4688_v58, %v4688_v58  ;;  %v4694_v52 = vadd.f32 %v1566_v4, %v857_v20  ;;  %v4696_v63 = vadd.f32 %v1609_v37, %v865_v15 }
 0x600   :  { %v1568_v48 = vpop.f32.mrf.mxu0  ;;  %v1611_v6 = vpop.f32.mrf.mxu1 }
 0x601   :  { %v1718_v33 = vmul.f32 %v1702_v27, %v4686_v26  ;;  %v1720_v36 = vmul.f32 %v1704_v31, %v4688_v58  ;;  %v1703_v54 = vmul.f32 %v4694_v52, %v4694_v52  ;;  %v1705_v38 = vmul.f32 %v4696_v63, %v4696_v63 }
 0x602   :  { %v4704_v40 = vadd.f32 %v1568_v48, %v853_v18  ;;  %v4706_v55 = vadd.f32 %v1611_v6, %v861_v19  ;;  %v1570_v43 = vpop.f32.mrf.mxu0  ;;  %v1613_v44 = vpop.f32.mrf.mxu1 }
 0x603   :  { %v1734_v46 = vmul.f32 0.044715, %v1718_v33  ;;  %v1736_v39 = vmul.f32 0.044715, %v1720_v36  ;;  %v1719_v29 = vmul.f32 %v1703_v54, %v4694_v52  ;;  %v1721_v30 = vmul.f32 %v1705_v38, %v4696_v63 }
 0x604   :  { %v1710_v51 = vmul.f32 %v4704_v40, %v4704_v40  ;;  %v1712_v34 = vmul.f32 %v4706_v55, %v4706_v55  ;;  %v4714_v2 = vadd.f32 %v1570_v43, %v857_v20  ;;  %v4716_v35 = vadd.f32 %v1613_v44, %v865_v15 }
 0x605   :  { %v1750_v11 = vadd.f32 %v1734_v46, %v4686_v26  ;;  %v1752_v53 = vadd.f32 %v1736_v39, %v4688_v58  ;;  %v1735_v57 = vmul.f32 0.044715, %v1719_v29  ;;  %v1737_v28 = vmul.f32 0.044715, %v1721_v30 }
 0x606   :  { %v1726_v10 = vmul.f32 %v1710_v51, %v4704_v40  ;;  %v1728_v61 = vmul.f32 %v1712_v34, %v4706_v55  ;;  %v1711_v32 = vmul.f32 %v4714_v2, %v4714_v2  ;;  %v1713_v12 = vmul.f32 %v4716_v35, %v4716_v35 }
 0x607   :  { %v1766_v0 = vmul.f32 0.7978846, %v1750_v11  ;;  %v1768_v3 = vmul.f32 0.7978846, %v1752_v53  ;;  %v1751_v5 = vadd.f32 %v1735_v57, %v4694_v52  ;;  %v1753_v7 = vadd.f32 %v1737_v28, %v4696_v63 }
 0x608   :  { %v1742_v47 = vmul.f32 0.044715, %v1726_v10  ;;  %v1744_v42 = vmul.f32 0.044715, %v1728_v61  ;;  %v1727_v9 = vmul.f32 %v1711_v32, %v4714_v2  ;;  %v1729_v62 = vmul.f32 %v1713_v12, %v4716_v35 }
 0x609   :  { %3646 = vtanh.f32 %v1766_v0  ;;  %v1767_v60 = vmul.f32 0.7978846, %v1751_v5  ;;  %v1769_v13 = vmul.f32 0.7978846, %v1753_v7 }
 0x60a   :  { %3648 = vtanh.f32 %v1768_v3  ;;  %v1758_v56 = vadd.f32 %v1742_v47, %v4704_v40  ;;  %v1760_v14 = vadd.f32 %v1744_v42, %v4706_v55  ;;  %v1743_v16 = vmul.f32 0.044715, %v1727_v9  ;;  %v3508_v9 = vld [vmem:[%s5064_s9 + $0x254] ss:$8 sps:$4 sm:$0xff]  }
 0x60b   :  { %3650 = vtanh.f32 %v1767_v60  ;;  %v1745_v17 = vmul.f32 0.044715, %v1729_v62  ;;  %v3511_v62 = vld [vmem:[%s5064_s9 + $0x354] ss:$8 sps:$4 sm:$0xff]   ;;  %v3506_v60 = vld [vmem:[%s5064_s9 + $0x250] ss:$8 sps:$4 sm:$0xff]  }
 0x60c   :  { %3652 = vtanh.f32 %v1769_v13  ;;  %v1774_v1 = vmul.f32 0.7978846, %v1758_v56  ;;  %v1776_v8 = vmul.f32 0.7978846, %v1760_v14  ;;  %v1759_v18 = vadd.f32 %v1743_v16, %v4714_v2  ;;  %v3509_v13 = vld [vmem:[%s5064_s9 + $0x350] ss:$8 sps:$4 sm:$0xff]  }
 0x60d   :  { %v1761_v19 = vadd.f32 %v1745_v17, %v4716_v35  ;;  %v3514_v56 = vld [vmem:[%s5064_s9 + $0x244] ss:$8 sps:$4 sm:$0xff]   ;;  %v3512_v16 = vld [vmem:[%s5064_s9 + $0x240] ss:$8 sps:$4 sm:$0xff]  }
 0x60e   :  { %3654 = vtanh.f32 %v1774_v1  ;;  %v1775_v20 = vmul.f32 0.7978846, %v1759_v18  ;;  %v3517_v14 = vld [vmem:[%s5064_s9 + $0x344] ss:$8 sps:$4 sm:$0xff]   ;;  %v3515_v17 = vld [vmem:[%s5064_s9 + $0x340] ss:$8 sps:$4 sm:$0xff]  }
 0x60f   :  { %3656 = vtanh.f32 %v1776_v8  ;;  %v1777_v15 = vmul.f32 0.7978846, %v1761_v19  ;;  %v3520_v1 = vld [vmem:[%s5064_s9 + $0x234] ss:$8 sps:$4 sm:$0xff]   ;;  %v3518_v18 = vld [vmem:[%s5064_s9 + $0x230] ss:$8 sps:$4 sm:$0xff]  }
 0x610   :  { %3658 = vtanh.f32 %v1775_v20  ;;  %v3523_v8 = vld [vmem:[%s5064_s9 + $0x334] ss:$8 sps:$4 sm:$0xff]   ;;  %v3521_v19 = vld [vmem:[%s5064_s9 + $0x330] ss:$8 sps:$4 sm:$0xff]   ;;  %v3526_v20 = vld [vmem:[%s5064_s9 + $0x224] ss:$8 sps:$4 sm:$0xff]  }
 0x611   :  { %3660 = vtanh.f32 %v1777_v15  ;;  %v868_v15 = vsub.s32 4, %v3831_v21 }
 0x616   :  { %v3647_v24 = vpop.eup %3646 }
 0x617   :  { %v3649_v25 = vpop.eup %3648  ;;  %v1798_v48 = vadd.f32 1.0, %v3647_v24  ;;  %v876_v24 = vsub.s32 6, %v3831_v21 }
 0x618   :  { %v3651_v4 = vpop.eup %3650  ;;  %v1800_v36 = vadd.f32 1.0, %v3649_v25  ;;  %v3529_v25 = vld [vmem:[%s5064_s9 + $0x324] ss:$8 sps:$4 sm:$0xff]  }
 0x619   :  { %v3653_v37 = vpop.eup %3652  ;;  %v1799_v27 = vadd.f32 1.0, %v3651_v4  ;;  %v1814_v30 = vmul.f32 0.5, %v1798_v48  ;;  %v872_v4 = vsub.s32 5, %v3831_v21  ;;  %v869_v48 = vrot.slane %v4677_v45, %v868_v15 }
 0x61a   :  { %v1801_v6 = vadd.f32 1.0, %v3653_v37  ;;  %v1816_v53 = vmul.f32 0.5, %v1800_v36  ;;  %v880_v37 = vsub.s32 7, %v3831_v21  ;;  %v3535_v21 = vld [vmem:[%s5064_s9 + $0x314] ss:$8 sps:$4 sm:$0xff]  }
 0x61b   :  { %v3655_v31 = vpop.eup %3654  ;;  %v1815_v29 = vmul.f32 0.5, %v1799_v27  ;;  %v1830_v0 = vmul.f32 %v1814_v30, %v4686_v26  ;;  %v3502_v26 = vld [vmem:[%s5064_s9 + $0x264] ss:$8 sps:$4 sm:$0xff]   ;;  %v3524_v27 = vld [vmem:[%s5064_s9 + $0x220] ss:$8 sps:$4 sm:$0xff]   ;;  %v873_v36 = vrot.slane %v4677_v45, %v872_v4 }
 0x61c   :  { %v3657_v33 = vpop.eup %3656  ;;  %v1806_v54 = vadd.f32 1.0, %v3655_v31  ;;  %v1817_v11 = vmul.f32 0.5, %v1801_v6  ;;  %v1832_v7 = vmul.f32 %v1816_v53, %v4688_v58  ;;  %v3505_v58 = vld [vmem:[%s5064_s9 + $0x364] ss:$8 sps:$4 sm:$0xff]   ;;  %v3527_v31 = vld [vmem:[%s5064_s9 + $0x320] ss:$8 sps:$4 sm:$0xff]   ;;  %v877_v6 = vrot.slane %v4677_v45, %v876_v24 }
 0x61d   :  { %v3659_v38 = vpop.eup %3658  ;;  %v1808_v43 = vadd.f32 1.0, %v3657_v33  ;;  %v1831_v32 = vmul.f32 %v1815_v29, %v4694_v52  ;;  %v3497_v52 = vld [vmem:[%s5064_s9 + $0x370] ss:$8 sps:$4 sm:$0xff]   ;;  %v3532_v33 = vld [vmem:[%s5064_s9 + $0x214] ss:$8 sps:$4 sm:$0xff]  }
 0x61e   :  { %v3661_v44 = vpop.eup %3660  ;;  %v1822_v46 = vmul.f32 0.5, %v1806_v54  ;;  %v1807_v39 = vadd.f32 1.0, %v3659_v38  ;;  %v1833_v3 = vmul.f32 %v1817_v11, %v4696_v63  ;;  %v881_v54 = vrot.slane %v4677_v45, %v880_v37  ;;  %v3533_v29 = vld [vmem:[%s5064_s9 + $0x310] ss:$8 sps:$4 sm:$0xff]   ;;  %v3538_v45 = vld [vmem:[%s5064_s9 + $0x204] ss:$8 sps:$4 sm:$0xff]  }
 0x61f   :  { %v1824_v51 = vmul.f32 0.5, %v1808_v43  ;;  %v1809_v34 = vadd.f32 1.0, %v3661_v44  ;;  %v3530_v44 = vld [vmem:[%s5064_s9 + $0x210] ss:$8 sps:$4 sm:$0xff]  }
 0x620   :  { %v1823_v57 = vmul.f32 0.5, %v1807_v39  ;;  %v1838_v28 = vmul.f32 %v1822_v46, %v4704_v40  ;;  %v3494_v40 = vld [vmem:[%s5064_s9 + $0x270] ss:$8 sps:$4 sm:$0xff]  }
 0x621   :  { %v1825_v10 = vmul.f32 0.5, %v1809_v34  ;;  %v1840_v61 = vmul.f32 %v1824_v51, %v4706_v55  ;;  %v3541_v34 = vld [vmem:[%s5064_s9 + $0x304] ss:$8 sps:$4 sm:$0xff]  }
 0x622   :  { %v1839_v12 = vmul.f32 %v1823_v57, %v4714_v2  ;;  %v1846_v55 = vpack.c.bf16 %v1838_v28, %v1830_v0  ;;  %v3500_v2 = vld [vmem:[%s5064_s9 + $0x260] ss:$8 sps:$4 sm:$0xff]  }
 0x623   :  { %v1841_v5 = vmul.f32 %v1825_v10, %v4716_v35  ;;  %v1848_v63 = vpack.c.bf16 %v1840_v61, %v1832_v7  ;;  %v3503_v35 = vld [vmem:[%s5064_s9 + $0x360] ss:$8 sps:$4 sm:$0xff]  }
 0x624   :  { %v1847_v47 = vpack.c.bf16 %v1839_v12, %v1831_v32  ;;  %v3536_v32 = vld [vmem:[%s5064_s9 + $0x200] ss:$8 sps:$4 sm:$0xff]  }
 0x625   :  { %v1849_v42 = vpack.c.bf16 %v1841_v5, %v1833_v3  ;;  %v3539_v7 = vld [vmem:[%s5064_s9 + $0x300] ss:$8 sps:$4 sm:$0xff]  }
 0x626   :  { %2665 = vmatprep.mubr.bf16.mxu0 %v1847_v47  ;;  %v3544_v47 = vld [vmem:[%s5064_s9 + $0x2f4] ss:$8 sps:$4 sm:$0xff]  }
 0x627   :  { %2708 = vmatprep.mubr.bf16.mxu1 %v1849_v42  ;;  %2666 = vmatmul.mubr.bf16.vlgmr.msra.gmra.mxu0 %v1846_v55 }
 0x628   :  { %2709 = vmatmul.mubr.bf16.vlgmr.msra.gmra.mxu1 %v1848_v63  ;;  %2720 = vmatpush1.bf16.msra.mxu0 %v3494_v40 }
 0x629   :  { %2763 = vmatpush1.bf16.msra.mxu1 %v3497_v52  ;;  %2721 = vmatprep.subr.bf16.mxu0 %v3502_v26  ;;  %v3547_v26 = vld [vmem:[%s5064_s9 + $0x3f4] ss:$8 sps:$4 sm:$0xff]  }
 0x62a   :  { %2764 = vmatprep.subr.bf16.mxu1 %v3505_v58 }
 0x62c   :  { %2722 = vmatpush1.bf16.msra.mxu0 %v3500_v2 }
 0x62d   :  { %2765 = vmatpush1.bf16.msra.mxu1 %v3503_v35  ;;  %2723 = vmatprep.subr.bf16.mxu0 %v3508_v9 }
 0x62e   :  { %2766 = vmatprep.subr.bf16.mxu1 %v3511_v62 }
 0x630   :  { %2724 = vmatpush1.bf16.msra.mxu0 %v3506_v60 }
 0x631   :  { %2767 = vmatpush1.bf16.msra.mxu1 %v3509_v13  ;;  %2725 = vmatprep.subr.bf16.mxu0 %v3514_v56  ;;  %v3542_v56 = vld [vmem:[%s5064_s9 + $0x2f0] ss:$8 sps:$4 sm:$0xff]  }
 0x632   :  { %2768 = vmatprep.subr.bf16.mxu1 %v3517_v14  ;;  %v3545_v14 = vld [vmem:[%s5064_s9 + $0x3f0] ss:$8 sps:$4 sm:$0xff]  }
 0x634   :  { %2726 = vmatpush1.bf16.msra.mxu0 %v3512_v16 }
 0x635   :  { %2769 = vmatpush1.bf16.msra.mxu1 %v3515_v17  ;;  %2727 = vmatprep.subr.bf16.mxu0 %v3520_v1 }
 0x636   :  { %2770 = vmatprep.subr.bf16.mxu1 %v3523_v8 }
 0x638   :  { %2728 = vmatpush1.bf16.msra.mxu0 %v3518_v18  ;;  %v3550_v18 = vld [vmem:[%s5064_s9 + $0x2e4] ss:$8 sps:$4 sm:$0xff]  }
 0x639   :  { %2771 = vmatpush1.bf16.msra.mxu1 %v3521_v19  ;;  %2729 = vmatprep.subr.bf16.mxu0 %v3526_v20 }
 0x63a   :  { %2772 = vmatprep.subr.bf16.mxu1 %v3529_v25  ;;  %v3553_v25 = vld [vmem:[%s5064_s9 + $0x3e4] ss:$8 sps:$4 sm:$0xff]  }
 0x63c   :  { %2730 = vmatpush1.bf16.msra.mxu0 %v3524_v27  ;;  %v1650_v38 = vpop.f32.mrf.mxu0  ;;  %v1693_v43 = vpop.f32.mrf.mxu1 }
 0x63d   :  { %2773 = vmatpush1.bf16.msra.mxu1 %v3527_v31  ;;  %v4825_v46 = vadd.f32 %v1650_v38, %v869_v48  ;;  %v4827_v39 = vadd.f32 %v1693_v43, %v877_v6  ;;  %2731 = vmatprep.subr.bf16.mxu0 %v3532_v33 }
 0x63e   :  { %v1652_v30 = vpop.f32.mrf.mxu0  ;;  %v1695_v51 = vpop.f32.mrf.mxu1  ;;  %2774 = vmatprep.subr.bf16.mxu1 %v3535_v21 }
 0x63f   :  { %v1706_v11 = vmul.f32 %v4825_v46, %v4825_v46  ;;  %v1708_v53 = vmul.f32 %v4827_v39, %v4827_v39  ;;  %v4842_v57 = vadd.f32 %v1652_v30, %v873_v36  ;;  %v4844_v28 = vadd.f32 %v1695_v51, %v881_v54 }
 0x640   :  { %2732 = vmatpush1.bf16.msra.mxu0 %v3530_v44  ;;  %v1654_v10 = vpop.f32.mrf.mxu0  ;;  %v1697_v61 = vpop.f32.mrf.mxu1  ;;  %v3556_v44 = vld [vmem:[%s5064_s9 + $0x2d4] ss:$8 sps:$4 sm:$0xff]  }
 0x641   :  { %v1722_v12 = vmul.f32 %v1706_v11, %v4825_v46  ;;  %v1724_v0 = vmul.f32 %v1708_v53, %v4827_v39  ;;  %v1707_v3 = vmul.f32 %v4842_v57, %v4842_v57  ;;  %v1709_v5 = vmul.f32 %v4844_v28, %v4844_v28  ;;  %2775 = vmatpush1.bf16.msra.mxu1 %v3533_v29 }
 0x642   :  { %v4861_v40 = vadd.f32 %v1654_v10, %v869_v48  ;;  %v4863_v42 = vadd.f32 %v1697_v61, %v877_v6  ;;  %v1656_v52 = vpop.f32.mrf.mxu0  ;;  %v1699_v55 = vpop.f32.mrf.mxu1  ;;  %2733 = vmatprep.subr.bf16.mxu0 %v3538_v45  ;;  %2776 = vmatprep.subr.bf16.mxu1 %v3541_v34  ;;  %v3548_v48 = vld [vmem:[%s5064_s9 + $0x2e0] ss:$8 sps:$4 sm:$0xff]   ;;  %v3559_v45 = vld [vmem:[%s5064_s9 + $0x3d4] ss:$8 sps:$4 sm:$0xff]   ;;  %v3554_v61 = vld [vmem:[%s5064_s9 + $0x2d0] ss:$8 sps:$4 sm:$0xff]  }
 0x643   :  { %v1738_v63 = vmul.f32 0.044715, %v1722_v12  ;;  %v1740_v58 = vmul.f32 0.044715, %v1724_v0  ;;  %v1723_v2 = vmul.f32 %v1707_v3, %v4842_v57  ;;  %v1725_v35 = vmul.f32 %v1709_v5, %v4844_v28  ;;  %v3557_v12 = vld [vmem:[%s5064_s9 + $0x3d0] ss:$8 sps:$4 sm:$0xff]  }
 0x644   :  { %v1714_v9 = vmul.f32 %v4861_v40, %v4861_v40  ;;  %v1716_v62 = vmul.f32 %v4863_v42, %v4863_v42  ;;  %v4874_v60 = vadd.f32 %v1656_v52, %v873_v36  ;;  %v4876_v13 = vadd.f32 %v1699_v55, %v881_v54  ;;  %2734 = vmatpush1.bf16.msra.mxu0 %v3536_v32  ;;  %v3551_v54 = vld [vmem:[%s5064_s9 + $0x3e0] ss:$8 sps:$4 sm:$0xff]   ;;  %v3562_v0 = vld [vmem:[%s5064_s9 + $0x2c4] ss:$8 sps:$4 sm:$0xff]   ;;  %v3568_v55 = vld [vmem:[%s5064_s9 + $0x2b4] ss:$8 sps:$4 sm:$0xff]  }
 0x645   :  { %v1754_v16 = vadd.f32 %v1738_v63, %v4825_v46  ;;  %v1756_v17 = vadd.f32 %v1740_v58, %v4827_v39  ;;  %v1739_v1 = vmul.f32 0.044715, %v1723_v2  ;;  %v1741_v8 = vmul.f32 0.044715, %v1725_v35  ;;  %2777 = vmatpush1.bf16.msra.mxu1 %v3539_v7  ;;  %2735 = vmatprep.subr.bf16.mxu0 %v3544_v47  ;;  %v3565_v5 = vld [vmem:[%s5064_s9 + $0x3c4] ss:$8 sps:$4 sm:$0xff]  }
 0x646   :  { %v1730_v19 = vmul.f32 %v1714_v9, %v4861_v40  ;;  %v1732_v20 = vmul.f32 %v1716_v62, %v4863_v42  ;;  %v1715_v15 = vmul.f32 %v4874_v60, %v4874_v60  ;;  %v1717_v24 = vmul.f32 %v4876_v13, %v4876_v13  ;;  %2778 = vmatprep.subr.bf16.mxu1 %v3547_v26  ;;  %v3560_v47 = vld [vmem:[%s5064_s9 + $0x2c0] ss:$8 sps:$4 sm:$0xff]   ;;  %v3571_v26 = vld [vmem:[%s5064_s9 + $0x3b4] ss:$8 sps:$4 sm:$0xff]   ;;  %v3566_v63 = vld [vmem:[%s5064_s9 + $0x2b0] ss:$8 sps:$4 sm:$0xff]  }
 0x647   :  { %v1770_v4 = vmul.f32 0.7978846, %v1754_v16  ;;  %v1772_v37 = vmul.f32 0.7978846, %v1756_v17  ;;  %v1755_v27 = vadd.f32 %v1739_v1, %v4842_v57  ;;  %v1757_v31 = vadd.f32 %v1741_v8, %v4844_v28  ;;  %v3563_v52 = vld [vmem:[%s5064_s9 + $0x3c0] ss:$8 sps:$4 sm:$0xff]  }
 0x648   :  { %v1746_v6 = vmul.f32 0.044715, %v1730_v19  ;;  %v1748_v33 = vmul.f32 0.044715, %v1732_v20  ;;  %v1731_v21 = vmul.f32 %v1715_v15, %v4874_v60  ;;  %v1733_v36 = vmul.f32 %v1717_v24, %v4876_v13  ;;  %2736 = vmatpush2.bf16.msra.mxu0 %v3542_v56  ;;  %v3569_v58 = vld [vmem:[%s5064_s9 + $0x3b0] ss:$8 sps:$4 sm:$0xff]  }
 0x649   :  { %3662 = vtanh.f32 %v1770_v4  ;;  %v1771_v38 = vmul.f32 0.7978846, %v1755_v27  ;;  %v1773_v43 = vmul.f32 0.7978846, %v1757_v31  ;;  %2779 = vmatpush2.bf16.msra.mxu1 %v3545_v14  ;;  %2737 = vmatprep.subr.bf16.mxu0 %v3550_v18  ;;  %v3574_v2 = vld [vmem:[%s5064_s9 + $0x2a4] ss:$8 sps:$4 sm:$0xff]  }
 0x64a   :  { %3664 = vtanh.f32 %v1772_v37  ;;  %v1762_v29 = vadd.f32 %v1746_v6, %v4861_v40  ;;  %v1764_v30 = vadd.f32 %v1748_v33, %v4863_v42  ;;  %v1747_v51 = vmul.f32 0.044715, %v1731_v21  ;;  %2780 = vmatprep.subr.bf16.mxu1 %v3553_v25  ;;  %v3577_v9 = vld [vmem:[%s5064_s9 + $0x3a4] ss:$8 sps:$4 sm:$0xff]   ;;  %v3572_v14 = vld [vmem:[%s5064_s9 + $0x2a0] ss:$8 sps:$4 sm:$0xff]  }
 0x64b   :  { %3666 = vtanh.f32 %v1771_v38  ;;  %v1749_v34 = vmul.f32 0.044715, %v1733_v36  ;;  %v3575_v17 = vld [vmem:[%s5064_s9 + $0x3a0] ss:$8 sps:$4 sm:$0xff]   ;;  %v3580_v1 = vld [vmem:[%s5064_s9 + $0x294] ss:$8 sps:$4 sm:$0xff]  }
 0x64c   :  { %3668 = vtanh.f32 %v1773_v43  ;;  %v1778_v11 = vmul.f32 0.7978846, %v1762_v29  ;;  %v1780_v53 = vmul.f32 0.7978846, %v1764_v30  ;;  %v1763_v10 = vadd.f32 %v1747_v51, %v4874_v60  ;;  %2738 = vmatpush2.bf16.msra.mxu0 %v3548_v48  ;;  %v3583_v8 = vld [vmem:[%s5064_s9 + $0x394] ss:$8 sps:$4 sm:$0xff]  }
 0x64d   :  { %v1765_v32 = vadd.f32 %v1749_v34, %v4876_v13  ;;  %2781 = vmatpush2.bf16.msra.mxu1 %v3551_v54  ;;  %2739 = vmatprep.subr.bf16.mxu0 %v3556_v44  ;;  %v3578_v37 = vld [vmem:[%s5064_s9 + $0x290] ss:$8 sps:$4 sm:$0xff]   ;;  %v3586_v6 = vld [vmem:[%s5064_s9 + $0x284] ss:$8 sps:$4 sm:$0xff]  }
 0x64e   :  { %3670 = vtanh.f32 %v1778_v11  ;;  %v1779_v3 = vmul.f32 0.7978846, %v1763_v10  ;;  %2782 = vmatprep.subr.bf16.mxu1 %v3559_v45  ;;  %v3581_v48 = vld [vmem:[%s5064_s9 + $0x390] ss:$8 sps:$4 sm:$0xff]   ;;  %v3589_v36 = vld [vmem:[%s5064_s9 + $0x384] ss:$8 sps:$4 sm:$0xff]  }
 0x64f   :  { %3672 = vtanh.f32 %v1780_v53  ;;  %v1781_v7 = vmul.f32 0.7978846, %v1765_v32  ;;  %v3584_v45 = vld [vmem:[%s5064_s9 + $0x280] ss:$8 sps:$4 sm:$0xff]  }
 0x650   :  { %3674 = vtanh.f32 %v1779_v3  ;;  %2740 = vmatpush2.bf16.msra.mxu0 %v3554_v61  ;;  %v3587_v53 = vld [vmem:[%s5064_s9 + $0x380] ss:$8 sps:$4 sm:$0xff]  }
 0x651   :  { %3676 = vtanh.f32 %v1781_v7  ;;  %2783 = vmatpush2.bf16.msra.mxu1 %v3557_v12  ;;  %2741 = vmatprep.subr.bf16.mxu0 %v3562_v0 }
 0x652   :  { %2784 = vmatprep.subr.bf16.mxu1 %v3565_v5 }
 0x654   :  { %2742 = vmatpush2.bf16.msra.mxu0 %v3560_v47 }
 0x655   :  { %2785 = vmatpush2.bf16.msra.mxu1 %v3563_v52  ;;  %2743 = vmatprep.subr.bf16.mxu0 %v3568_v55 }
 0x656   :  { %v3663_v35 = vpop.eup %3662  ;;  %2786 = vmatprep.subr.bf16.mxu1 %v3571_v26 }
 0x657   :  { %v3665_v62 = vpop.eup %3664  ;;  %v1802_v20 = vadd.f32 1.0, %v3663_v35 }
 0x658   :  { %v3667_v56 = vpop.eup %3666  ;;  %2744 = vmatpush2.bf16.msra.mxu0 %v3566_v63  ;;  %v1804_v25 = vadd.f32 1.0, %v3665_v62 }
 0x659   :  { %v3669_v16 = vpop.eup %3668  ;;  %2787 = vmatpush2.bf16.msra.mxu1 %v3569_v58  ;;  %2745 = vmatprep.subr.bf16.mxu0 %v3574_v2  ;;  %v1803_v18 = vadd.f32 1.0, %v3667_v56  ;;  %v1818_v43 = vmul.f32 0.5, %v1802_v20 }
 0x65a   :  { %2788 = vmatprep.subr.bf16.mxu1 %v3577_v9  ;;  %v1805_v15 = vadd.f32 1.0, %v3669_v16  ;;  %v1820_v51 = vmul.f32 0.5, %v1804_v25 }
 0x65b   :  { %v3671_v19 = vpop.eup %3670  ;;  %v1819_v38 = vmul.f32 0.5, %v1803_v18  ;;  %v1834_v0 = vmul.f32 %v1818_v43, %v4825_v46  ;;  %v3041_v46 = vld [vmem:[%s5057_s2 + $0x5] ss:$8 sm:$0x3] }
 0x65c   :  { %v3673_v24 = vpop.eup %3672  ;;  %v1810_v4 = vadd.f32 1.0, %v3671_v19  ;;  %2746 = vmatpush2.bf16.msra.mxu0 %v3572_v14  ;;  %v1821_v30 = vmul.f32 0.5, %v1805_v15  ;;  %v1836_v5 = vmul.f32 %v1820_v51, %v4827_v39  ;;  %v1990_v55 = vrot.slane %v3041_v46, %v3837_v23 }
 0x65d   :  { %v3675_v27 = vpop.eup %3674  ;;  %v1812_v31 = vadd.f32 1.0, %v3673_v24  ;;  %2789 = vmatpush2.bf16.msra.mxu1 %v3575_v17  ;;  %2747 = vmatprep.subr.bf16.mxu0 %v3580_v1  ;;  %v1835_v32 = vmul.f32 %v1819_v38, %v4842_v57 }
 0x65e   :  { %v3677_v33 = vpop.eup %3676  ;;  %v1826_v21 = vmul.f32 0.5, %v1810_v4  ;;  %2790 = vmatprep.subr.bf16.mxu1 %v3583_v8  ;;  %v1811_v54 = vadd.f32 1.0, %v3675_v27  ;;  %v1837_v3 = vmul.f32 %v1821_v30, %v4844_v28 }
 0x65f   :  { %v1828_v44 = vmul.f32 0.5, %v1812_v31  ;;  %v1813_v29 = vadd.f32 1.0, %v3677_v33 }
 0x660   :  { %2748 = vmatpush2.bf16.msra.mxu0 %v3578_v37  ;;  %v1827_v34 = vmul.f32 0.5, %v1811_v54  ;;  %v1842_v11 = vmul.f32 %v1826_v21, %v4861_v40 }
 0x661   :  { %2791 = vmatpush2.bf16.msra.mxu1 %v3581_v48  ;;  %2749 = vmatprep.subr.bf16.mxu0 %v3586_v6  ;;  %v1829_v10 = vmul.f32 0.5, %v1813_v29  ;;  %v1844_v61 = vmul.f32 %v1828_v44, %v4863_v42  ;;  %v3590_v29 = vld [vmem:[%s5065_s10 + $0x78] sm:$0xff]  }
 0x662   :  { %2792 = vmatprep.subr.bf16.mxu1 %v3589_v36  ;;  %v1843_v12 = vmul.f32 %v1827_v34, %v4874_v60  ;;  %v1850_v52 = vpack.c.bf16 %v1842_v11, %v1834_v0 }
 0x663   :  { %v1845_v40 = vmul.f32 %v1829_v10, %v4876_v13  ;;  %v1852_v42 = vpack.c.bf16 %v1844_v61, %v1836_v5  ;;  %v1986_v13 = vrot.slane %v3041_v46, %v3834_v22  ;;  %v3594_v5 = vld [vmem:[%s5065_s10 + $0x68] sm:$0xff]   ;;  %v3601_v46 = vld [vmem:[%s5065_s10 + $0x10] sm:$0xff]  }
 0x664   :  { %2750 = vmatpush2.bf16.msra.mxu0 %v3584_v45  ;;  %v1851_v7 = vpack.c.bf16 %v1843_v12, %v1835_v32 }
 0x665   :  { %2793 = vmatpush2.bf16.msra.mxu1 %v3587_v53  ;;  %v1853_v47 = vpack.c.bf16 %v1845_v40, %v1837_v3  ;;  %3341 = vmatprep.subr.bf16.mxu0 %v3590_v29  ;;  %v3593_v40 = vld [vmem:[%s5065_s10 + $0x30] sm:$0xff]  }
 0x666   :  { %2751 = vmatprep.mubr.bf16.mxu0 %v1851_v7  ;;  %v3595_v7 = vld [vmem:[%s5065_s10 + $0x28] sm:$0xff]  }
 0x667   :  { %2794 = vmatprep.mubr.bf16.mxu1 %v1853_v47  ;;  %2752 = vmatmul.mubr.bf16.vlgmr.msra.gmra.mxu0 %v1850_v52  ;;  %v3596_v47 = vld [vmem:[%s5065_s10 + $0x60] sm:$0xff]  }
 0x668   :  { %2795 = vmatmul.mubr.bf16.vlgmr.msra.gmra.mxu1 %v1852_v42  ;;  %v3597_v52 = vld [vmem:[%s5065_s10 + $0x20] sm:$0xff]   ;;  %v3598_v42 = vld [vmem:[%s5065_s10 + $0x58] sm:$0xff]  }
 0x6e7   :  { %v2667_v57 = vpop.f32.mrf.mxu0 }
 0x6e8   :  { %v2710_v60 = vpop.f32.mrf.mxu1  ;;  %v2668_v63 = vadd.f32 %v2667_v57, %v1986_v13  ;;  %v3599_v57 = vld [vmem:[%s5065_s10 + $0x18] sm:$0xff]  }
 0x6e9   :  { %v2669_v28 = vpop.f32.mrf.mxu0 }
 0x6ea   :  { %v2712_v39 = vpop.f32.mrf.mxu1  ;;  %v2670_v2 = vadd.f32 %v2669_v28, %v1990_v55  ;;  %v2711_v9 = vadd.f32 %v2710_v60, %v2668_v63  ;;  %v3600_v60 = vld [vmem:[%s5065_s10 + $0x50] sm:$0xff]   ;;  %v3602_v28 = vld [vmem:[%s5065_s10 + $0x48] sm:$0xff]  }
 0x6eb   :  { %v2671_v26 = vpop.f32.mrf.mxu0 }
 0x6ec   :  { %v2714_v58 = vpop.f32.mrf.mxu1  ;;  %v2672_v62 = vadd.f32 %v2671_v26, %v1986_v13  ;;  %v2713_v16 = vadd.f32 %v2712_v39, %v2670_v2  ;;  %v3603_v13 = vld [vmem:[%s5065_s10 + $0x8] sm:$0xff]   ;;  %v3604_v39 = vld [vmem:[%s5065_s10 + $0x40] sm:$0xff]  }
 0x6ed   :  { %v2673_v35 = vpop.f32.mrf.mxu0 }
 0x6ee   :  { %v2716_v56 = vpop.f32.mrf.mxu1  ;;  %v2674_v17 = vadd.f32 %v2673_v35, %v1990_v55  ;;  %v2715_v19 = vadd.f32 %v2714_v58, %v2672_v62  ;;  %v3605_v55 = vld [vmem:[%s5065_s10] sm:$0xff]  }
 0x6f0   :  { %v2717_v23 = vadd.f32 %v2716_v56, %v2674_v17 }
 0x727   :  { %v2753_v14 = vpop.f32.mrf.mxu0 }
 0x728   :  { %v2754_v1 = vadd.f32 %v2753_v14, %v2711_v9  ;;  %v2796_v8 = vpop.f32.mrf.mxu1 }
 0x729   :  { %v2755_v18 = vpop.f32.mrf.mxu0 }
 0x72a   :  { %v2797_v20 = vadd.f32 %v2796_v8, %v2754_v1  ;;  %v2756_v22 = vadd.f32 %v2755_v18, %v2713_v16  ;;  %v2798_v15 = vpop.f32.mrf.mxu1 }
 0x72b   :  { %v2757_v24 = vpop.f32.mrf.mxu0 }
 0x72c   :  { %v2799_v25 = vadd.f32 %v2798_v15, %v2756_v22  ;;  %v2758_v4 = vadd.f32 %v2757_v24, %v2715_v19  ;;  %v2800_v37 = vpop.f32.mrf.mxu1  ;;  %v2805_v31 = vadd.f32 %v2797_v20, %v4036_v41  ;;  %v3591_v41 = vld [vmem:[%s5065_s10 + $0x38] sm:$0xff]   ;;  %v3324_v20 = vld [vmem:[%s5066_s11] ss:$0 sm:$0xff] }
 0x72d   :  { %v2759_v27 = vpop.f32.mrf.mxu0  ;;  %3342 = vmatpush3.bf16.msra.mxu0 %v3591_v41 }
 0x72e   :  { %v2806_v48 = vadd.f32 %v2799_v25, %v4039_v59  ;;  %v2801_v6 = vadd.f32 %v2800_v37, %v2758_v4  ;;  %v2760_v33 = vadd.f32 %v2759_v27, %v2717_v23  ;;  %v2802_v21 = vpop.f32.mrf.mxu1  ;;  %v3592_v59 = vld [vmem:[%s5065_s10 + $0x70] sm:$0xff]  }
 0x72f   :  { %3343 = vmatprep.subr.bf16.mxu0 %v3592_v59 }
 0x730   :  { %v2803_v36 = vadd.f32 %v2802_v21, %v2760_v33  ;;  %v2809_v54 = vadd.f32 %v2806_v48, %v2805_v31  ;;  %v2807_v38 = vadd.f32 %v2801_v6, %v4044_v49 }
 0x731   :  { %3344 = vmatpush3.bf16.msra.mxu0 %v3593_v40 }
 0x732   :  { %v2808_v43 = vadd.f32 %v2803_v36, %v4047_v50  ;;  %2810 = vadd.xlane.f32.xlu0 %v2809_v54  ;;  %3345 = vmatprep.subr.bf16.mxu0 %v3594_v5 }
 0x734   :  { %v2812_v44 = vadd.f32 %v2808_v43, %v2807_v38 }
 0x735   :  { %3346 = vmatpush3.bf16.msra.mxu0 %v3595_v7 }
 0x736   :  { %2813 = vadd.xlane.f32.xlu1 %v2812_v44  ;;  %3347 = vmatprep.subr.bf16.mxu0 %v3596_v47 }
 0x739   :  { %3348 = vmatpush3.bf16.msra.mxu0 %v3597_v52 }
 0x73a   :  { %3349 = vmatprep.subr.bf16.mxu0 %v3598_v42 }
 0x73d   :  { %3350 = vmatpush3.bf16.msra.mxu0 %v3599_v57 }
 0x73e   :  { %3351 = vmatprep.subr.bf16.mxu0 %v3600_v60 }
 0x741   :  { %3352 = vmatpush3.bf16.msra.mxu0 %v3601_v46 }
 0x742   :  { %3353 = vmatprep.subr.bf16.mxu0 %v3602_v28 }
 0x745   :  { %3354 = vmatpush3.bf16.msra.mxu0 %v3603_v13 }
 0x746   :  { %3355 = vmatprep.subr.bf16.mxu0 %v3604_v39 }
 0x749   :  { %3356 = vmatpush3.bf16.msra.mxu0 %v3605_v55 }
 0x7bb   :  { %v2811_v49 = vpop.xlane.xlu0 %2810 }
 0x7bc   :  { %v2815_v50 = vmul.f32 0.00390625, %v2811_v49 }
 0x7be   :  { %v2817_v30 = vsub.f32 %v2805_v31, %v2815_v50  ;;  %v2818_v51 = vsub.f32 %v2806_v48, %v2815_v50 }
 0x7bf   :  { %v2814_v45 = vpop.xlane.xlu1 %2813 }
 0x7c0   :  { %v2816_v34 = vmul.f32 0.00390625, %v2814_v45  ;;  %v2821_v11 = vmul.f32 %v2817_v30, %v2817_v30  ;;  %v2822_v53 = vmul.f32 %v2818_v51, %v2818_v51 }
 0x7c2   :  { %v2819_v10 = vsub.f32 %v2807_v38, %v2816_v34  ;;  %v2820_v61 = vsub.f32 %v2808_v43, %v2816_v34  ;;  %v2825_v32 = vadd.f32 %v2822_v53, %v2821_v11 }
 0x7c4   :  { %2826 = vadd.xlane.f32.xlu0 %v2825_v32  ;;  %v2823_v12 = vmul.f32 %v2819_v10, %v2819_v10  ;;  %v2824_v0 = vmul.f32 %v2820_v61, %v2820_v61 }
 0x7c6   :  { %v2828_v3 = vadd.f32 %v2824_v0, %v2823_v12 }
 0x7c8   :  { %2829 = vadd.xlane.f32.xlu1 %v2828_v3 }
 0x84d   :  { %v2827_v26 = vpop.xlane.xlu0 %2826 }
 0x84e   :  { %v2831_v63 = vmul.f32 0.00390625, %v2827_v26 }
 0x850   :  { %v2833_v58 = vadd.f32 1e-05, %v2831_v63 }
 0x851   :  { %v2830_v2 = vpop.xlane.xlu1 %2829 }
 0x852   :  { %v2832_v35 = vmul.f32 0.00390625, %v2830_v2  ;;  %3678 = vrsqrt.f32 %v2833_v58 }
 0x854   :  { %v2834_v9 = vadd.f32 1e-05, %v2832_v35 }
 0x856   :  { %3680 = vrsqrt.f32 %v2834_v9 }
 0x85f   :  { %v3679_v62 = vpop.eup %3678 }
 0x860   :  { %v2838_v14 = vmul.f32 %v3679_v62, %v2818_v51  ;;  %v2837_v17 = vmul.f32 %v3679_v62, %v2817_v30 }
 0x863   :  { %v3681_v56 = vpop.eup %3680 }
 0x864   :  { %v2840_v16 = vmul.f32 %v3681_v56, %v2820_v61  ;;  %v2839_v1 = vmul.f32 %v3681_v56, %v2819_v10 }
 0x866   :  { %v2842_v8 = vpack.c.bf16 %v2840_v16, %v2838_v14  ;;  %v2841_v18 = vpack.c.bf16 %v2839_v1, %v2837_v17 }
 0x868   :  { %3010 = vmatprep.mubr.bf16.mxu0 %v2842_v8 }
 0x869   :  { %3011 = vmatmul.mubr.bf16.vlgmr.msra.gmra.mxu0 %v2841_v18 }
 0x929   :  { %v3357_v19 = vpop.f32.mrf.mxu0 }
 0x92b   :  { %v3358_v22 = vpop.f32.mrf.mxu0 }
 0x92c   :  { %v3359_v15 = vadd.f32 %v3358_v22, %v3357_v19 }
 0x92d   :  { %v3360_v24 = vpop.f32.mrf.mxu0 }
 0x92e   :  { %v3013_v23 = vadd.f32 %v3359_v15, %v3324_v20 }
 0x92f   :  { %v3361_v25 = vpop.f32.mrf.mxu0 }
 0x930   :  { %3019 = vst [vmem:[#allocation2] sm:$0xff] %v3013_v23  ;;  %v3362_v4 = vadd.f32 %v3361_v25, %v3360_v24 }
 0x932   :  { %v3016_v37 = vadd.f32 %v3362_v4, %v3324_v20 }
 0x934   :  { %3020 = vst [vmem:[#allocation2 + $0x8] sm:$0xff] %v3016_v37 }
 0x935   :  { %3693 = shalt.err (!%p3690_p4)
}
 0x936   :  { %s3706_s11 = smov 128   ;;  %s3707_s18 = smov 8  }
 0x937   :  { %3032 = dma.vmem_to_hbm [thread:$0]  %s3027_s8, 256, %s5067_s12, [#allocation3], %s3706_s11, %s3706_s11, %s3707_s18  }
 0x938   :  { %3702 = dma.done.wait [#allocation3], 256  }
 0x939   :  { %3703 = vsyncadd [#allocation3], 4294967040 }
 0x93a   :  { %3036 = vsyncpa [#allocation3], 1 }

</bundles_post_ra>
